<compile_context>
chip_gen: v7x
topology: tpu7x:2x2x1
jax: 0.10.0
libtpu: 0.0.40
codegen_flags: <defaults>
</compile_context>

<pallas_src>
import functools
import numpy as np
import jax
import jax.numpy as jnp
from jax.experimental import pallas as pl
from jax.experimental.pallas import tpu as pltpu

NUM_HEADS = 4
LN_EPS = 1e-5


def _sa_kernel(x_ref, gamma_ref, beta_ref, wqkv_ref, woh_ref, bo_ref,
               o_ref, colsum_ref, *, num_heads, seq_len):
    # x_ref: (B*V, C) rows of B sequences, each of length V = seq_len.
    y = x_ref[...]                                       # (BV, C) f32
    BV, C = y.shape
    V = seq_len
    B = BV // V
    hd = C // num_heads

    # LayerNorm over the channel axis (biased variance, like nn.LayerNorm).
    mean = jnp.mean(y, axis=-1, keepdims=True)
    var = jnp.mean(jnp.square(y - mean), axis=-1, keepdims=True)
    yn = (y - mean) * jax.lax.rsqrt(var + LN_EPS)
    yn = yn * gamma_ref[...] + beta_ref[...]             # (1,C) broadcasts

    # Fused QKV projection: one (BV, C) @ (C, 3C) matmul (weights pre-transposed).
    qkv = jnp.dot(yn, wqkv_ref[...], preferred_element_type=jnp.float32)
    qkv3 = qkv.reshape(B, V, 3 * C)                      # (B, V, 3C)

    scale = 1.0 / (hd ** 0.5)
    acc = jnp.zeros((BV, C), jnp.float32)                # output-projection accumulator
    colsum = jnp.zeros((1, V), jnp.float32)

    for h in range(num_heads):
        lo = h * hd
        qh = qkv3[:, :, lo:lo + hd]                      # (B, V, hd)
        kh = qkv3[:, :, C + lo:C + lo + hd]
        vh = qkv3[:, :, 2 * C + lo:2 * C + lo + hd]

        # Batched scores over all B sequences; contract last dims (no .T).
        s = jnp.einsum('bqd,bkd->bqk', qh, kh,
                       preferred_element_type=jnp.float32) * scale
        s = s - jnp.max(s, axis=-1, keepdims=True)
        p = jnp.exp(s)
        denom = jnp.sum(p, axis=-1, keepdims=True)
        attn = p * pl.reciprocal(denom, approx=False)    # (B, V, V) softmax
        # TODO(synk): nn.Dropout(0.1) on attn is identity in eval mode; no RNG applied.

        # sum over (batch, query) -> per-key column sums, accumulated over heads.
        colsum = colsum + jnp.sum(jnp.sum(attn, axis=0), axis=0, keepdims=True)

        oh = jnp.einsum('bqk,bkd->bqd', attn, vh,
                        preferred_element_type=jnp.float32)     # (B, V, hd)
        # Head output feeds the output projection directly: no lane concat.
        acc = acc + jnp.dot(oh.reshape(BV, hd), woh_ref[h],
                            preferred_element_type=jnp.float32)  # (BV, C)

    o_ref[...] = acc + bo_ref[...]
    colsum_ref[0] = colsum


def attention_layer_forward(x, params):
    """x: (N, C, T, V) float32. Returns (output (N,C,T,V), sum_attention (V,))."""
    N, C, T, V = x.shape
    gamma, beta, wq, wk, wv, wo, bo = params
    nh = NUM_HEADS
    hd = C // nh
    NB = N * T

    # Up to 2 parallel grid steps (both TensorCores on v7x); 1 if NB is odd.
    G = 2 if (NB % 2 == 0 and ((NB // 2) * V) % 8 == 0) else 1
    B = NB // G

    # n c t v -> ((n t) v) c : flat token-row layout for the kernel.
    y = jnp.transpose(x, (0, 2, 3, 1)).reshape(NB * V, C)

    # Pre-transposed / fused weights (host-side layout plumbing, one-time).
    wqkv_t = jnp.concatenate([wq.T, wk.T, wv.T], axis=1)   # (C, 3C)
    wo_h = wo.T.reshape(nh, hd, C)                         # per-head rows of Wo^T

    kernel = functools.partial(_sa_kernel, num_heads=nh, seq_len=V)

    out, colsum = pl.pallas_call(
        kernel,
        grid=(G,),
        in_specs=[
            pl.BlockSpec((B * V, C), lambda g: (g, 0)),          # x rows
            pl.BlockSpec((1, C), lambda g: (0, 0)),              # gamma
            pl.BlockSpec((1, C), lambda g: (0, 0)),              # beta
            pl.BlockSpec((C, 3 * C), lambda g: (0, 0)),          # fused Wqkv^T
            pl.BlockSpec((nh, hd, C), lambda g: (0, 0, 0)),      # head-split Wo^T
            pl.BlockSpec((1, C), lambda g: (0, 0)),              # bo
        ],
        out_specs=[
            pl.BlockSpec((B * V, C), lambda g: (g, 0)),          # attention output rows
            pl.BlockSpec((1, 1, V), lambda g: (g, 0, 0)),        # per-step attn col sums
        ],
        out_shape=[
            jax.ShapeDtypeStruct((NB * V, C), jnp.float32),
            jax.ShapeDtypeStruct((G, 1, V), jnp.float32),
        ],
        compiler_params=pltpu.CompilerParams(
            dimension_semantics=("parallel",)),
    )(y, gamma.reshape(1, C), beta.reshape(1, C), wqkv_t, wo_h,
      bo.reshape(1, C))

    # ((n t) v) c -> n c t v
    output = out.reshape(N, T, V, C).transpose(0, 3, 1, 2)
    sum_attention = colsum.reshape(G, V).sum(axis=0)
    return output, sum_attention


def _reference_forward(x, params):
    """Pure-JAX reference mirroring the PyTorch forward (eval mode)."""
    gamma, beta, wq, wk, wv, wo, bo = params
    N, C, T, V = x.shape
    nh, hd = NUM_HEADS, C // NUM_HEADS
    y = jnp.transpose(x, (0, 2, 3, 1))                      # (N,T,V,C)
    mean = y.mean(-1, keepdims=True)
    var = ((y - mean) ** 2).mean(-1, keepdims=True)
    yn = (y - mean) / jnp.sqrt(var + LN_EPS) * gamma + beta
    q = (yn @ wq.T).reshape(N * T, V, nh, hd).transpose(0, 2, 1, 3)
    k = (yn @ wk.T).reshape(N * T, V, nh, hd).transpose(0, 2, 1, 3)
    v = (yn @ wv.T).reshape(N * T, V, nh, hd).transpose(0, 2, 1, 3)
    s = jnp.einsum('bhqd,bhkd->bhqk', q, k) / (hd ** 0.5)
    attn = jax.nn.softmax(s, axis=-1)
    ao = jnp.einsum('bhqk,bhkd->bhqd', attn, v)
    ao = ao.transpose(0, 2, 1, 3).reshape(N, T * V, C)
    out = ao @ wo.T + bo
    out = out.reshape(N, T, V, C).transpose(0, 3, 1, 2)
    sum_att = attn.sum(axis=2).sum(axis=1).sum(axis=0)
    return out, sum_att


def make_params(key, channel):
    ks = jax.random.split(key, 7)
    scale = 1.0 / np.sqrt(channel)
    gamma = jnp.ones((channel,), jnp.float32) + 0.05 * jax.random.normal(ks[0], (channel,))
    beta = 0.05 * jax.random.normal(ks[1], (channel,))
    wq = scale * jax.random.normal(ks[2], (channel, channel), jnp.float32)
    wk = scale * jax.random.normal(ks[3], (channel, channel), jnp.float32)
    wv = scale * jax.random.normal(ks[4], (channel, channel), jnp.float32)
    wo = scale * jax.random.normal(ks[5], (channel, channel), jnp.float32)
    bo = 0.05 * jax.random.normal(ks[6], (channel,), jnp.float32)
    return (gamma, beta, wq, wk, wv, wo, bo)


if __name__ == "__main__":
    key = jax.random.PRNGKey(0)
    kx, kp = jax.random.split(key)
    N, C, T, V = 2, 32, 8, 8          # (N, C, T, V) NCHW-style input
    x = jax.random.normal(kx, (N, C, T, V), jnp.float32)
    params = make_params(kp, C)

    out, sum_att = attention_layer_forward(x, params)
    out, sum_att = jax.block_until_ready((out, sum_att))

    ref_out, ref_sum = _reference_forward(x, params)
    assert out.shape == (N, C, T, V) and sum_att.shape == (V,)
    np.testing.assert_allclose(np.asarray(out), np.asarray(ref_out),
                               rtol=1e-4, atol=1e-4)
    np.testing.assert_allclose(np.asarray(sum_att), np.asarray(ref_sum),
                               rtol=1e-4, atol=1e-4)
    print("KERNEL_OK")
</pallas_src>

<mosaic_0001>
module attributes {stable_mosaic.version = 11 : i64} {
  func.func @_sa_kernel(%arg0: i32, %arg1: memref<64x32xf32, #tpu.memory_space<vmem>>, %arg2: memref<1x32xf32, #tpu.memory_space<vmem>>, %arg3: memref<1x32xf32, #tpu.memory_space<vmem>>, %arg4: memref<32x96xf32, #tpu.memory_space<vmem>>, %arg5: memref<4x8x32xf32, #tpu.memory_space<vmem>>, %arg6: memref<1x32xf32, #tpu.memory_space<vmem>>, %arg7: memref<64x32xf32, #tpu.memory_space<vmem>>, %arg8: memref<1x1x8xf32, #tpu.memory_space<vmem>>) attributes {dimension_semantics = [#tpu.dimension_semantics<parallel>], iteration_bounds = array<i64: 2>, scalar_prefetch = 0 : i64, scratch_operands = 0 : i64, tpu.core_type = #tpu.core_type<tc>, window_params = [{transform_indices = @transform_0, window_bounds = array<i64: 64, 32>}, {pipeline_mode = #tpu.pipeline_mode<synchronous>, transform_indices = @transform_1, window_bounds = array<i64: 1, 32>}, {pipeline_mode = #tpu.pipeline_mode<synchronous>, transform_indices = @transform_2, window_bounds = array<i64: 1, 32>}, {pipeline_mode = #tpu.pipeline_mode<synchronous>, transform_indices = @transform_3, window_bounds = array<i64: 32, 96>}, {pipeline_mode = #tpu.pipeline_mode<synchronous>, transform_indices = @transform_4, window_bounds = array<i64: 4, 8, 32>}, {pipeline_mode = #tpu.pipeline_mode<synchronous>, transform_indices = @transform_5, window_bounds = array<i64: 1, 32>}, {transform_indices = @transform_6, window_bounds = array<i64: 64, 32>}, {transform_indices = @transform_7, window_bounds = array<i64: 1, 1, 8>}]} {
    %c0 = arith.constant 0 : index
    %c0_0 = arith.constant 0 : index
    %0 = vector.load %arg1[%c0, %c0_0] : memref<64x32xf32, #tpu.memory_space<vmem>>, vector<64x32xf32>
    %cst = arith.constant dense<0.000000e+00> : vector<64xf32>
    %1 = vector.multi_reduction <add>, %0, %cst [1] : vector<64x32xf32> to vector<64xf32>
    %2 = vector.shape_cast %1 : vector<64xf32> to vector<64x1xf32>
    %cst_1 = arith.constant 3.200000e+01 : f32
    %3 = vector.broadcast %cst_1 : f32 to vector<64x1xf32>
    %4 = arith.divf %2, %3 : vector<64x1xf32>
    %5 = vector.broadcast %4 : vector<64x1xf32> to vector<64x32xf32>
    %6 = arith.subf %0, %5 : vector<64x32xf32>
    %7 = arith.mulf %6, %6 : vector<64x32xf32>
    %cst_2 = arith.constant dense<0.000000e+00> : vector<64xf32>
    %8 = vector.multi_reduction <add>, %7, %cst_2 [1] : vector<64x32xf32> to vector<64xf32>
    %9 = vector.shape_cast %8 : vector<64xf32> to vector<64x1xf32>
    %cst_3 = arith.constant 3.200000e+01 : f32
    %10 = vector.broadcast %cst_3 : f32 to vector<64x1xf32>
    %11 = arith.divf %9, %10 : vector<64x1xf32>
    %12 = vector.broadcast %4 : vector<64x1xf32> to vector<64x32xf32>
    %13 = arith.subf %0, %12 : vector<64x32xf32>
    %cst_4 = arith.constant 9.99999974E-6 : f32
    %14 = vector.broadcast %cst_4 : f32 to vector<64x1xf32>
    %15 = arith.addf %11, %14 : vector<64x1xf32>
    %16 = math.rsqrt %15 : vector<64x1xf32>
    %17 = vector.broadcast %16 : vector<64x1xf32> to vector<64x32xf32>
    %18 = arith.mulf %13, %17 : vector<64x32xf32>
    %c0_5 = arith.constant 0 : index
    %c0_6 = arith.constant 0 : index
    %19 = vector.load %arg2[%c0_5, %c0_6] : memref<1x32xf32, #tpu.memory_space<vmem>>, vector<1x32xf32>
    %20 = vector.broadcast %19 : vector<1x32xf32> to vector<64x32xf32>
    %21 = arith.mulf %18, %20 : vector<64x32xf32>
    %c0_7 = arith.constant 0 : index
    %c0_8 = arith.constant 0 : index
    %22 = vector.load %arg3[%c0_7, %c0_8] : memref<1x32xf32, #tpu.memory_space<vmem>>, vector<1x32xf32>
    %23 = vector.broadcast %22 : vector<1x32xf32> to vector<64x32xf32>
    %24 = arith.addf %21, %23 : vector<64x32xf32>
    %c0_9 = arith.constant 0 : index
    %c0_10 = arith.constant 0 : index
    %25 = vector.load %arg4[%c0_9, %c0_10] : memref<32x96xf32, #tpu.memory_space<vmem>>, vector<32x96xf32>
    %cst_11 = arith.constant dense<0.000000e+00> : vector<64x96xf32>
    %26 = tpu.matmul %24, %25, %cst_11 {dimension_numbers = #tpu.dot_dimension_numbers<[1], [0], [0], [1], [0, 0, 1, 1], [], []>} : vector<64x32xf32>, vector<32x96xf32>, vector<64x96xf32> -> vector<64x96xf32>
    %27 = vector.shape_cast %26 : vector<64x96xf32> to vector<8x8x96xf32>
    %cst_12 = arith.constant 0.000000e+00 : f32
    %28 = vector.broadcast %cst_12 : f32 to vector<64x32xf32>
    %cst_13 = arith.constant 0.000000e+00 : f32
    %29 = vector.broadcast %cst_13 : f32 to vector<1x8xf32>
    %30 = vector.extract_strided_slice %27 {offsets = [0, 0, 0], sizes = [8, 8, 8], strides = [1, 1, 1]} : vector<8x8x96xf32> to vector<8x8x8xf32>
    %31 = vector.extract_strided_slice %27 {offsets = [0, 0, 32], sizes = [8, 8, 8], strides = [1, 1, 1]} : vector<8x8x96xf32> to vector<8x8x8xf32>
    %32 = vector.extract_strided_slice %27 {offsets = [0, 0, 64], sizes = [8, 8, 8], strides = [1, 1, 1]} : vector<8x8x96xf32> to vector<8x8x8xf32>
    "tpu.trace_start"() <{level = 10 : i32, message = "bqd,bkd->bqk"}> : () -> ()
    %cst_14 = arith.constant dense<0.000000e+00> : vector<8x8x8xf32>
    %33 = tpu.matmul %30, %31, %cst_14 {dimension_numbers = #tpu.dot_dimension_numbers<[2], [2], [1], [1], [0, 0, 0, 1, 1, 1], [0], [0]>} : vector<8x8x8xf32>, vector<8x8x8xf32>, vector<8x8x8xf32> -> vector<8x8x8xf32>
    "tpu.trace_stop"() : () -> ()
    %cst_15 = arith.constant 0.353553385 : f32
    %34 = vector.broadcast %cst_15 : f32 to vector<8x8x8xf32>
    %35 = arith.mulf %33, %34 : vector<8x8x8xf32>
    %cst_16 = arith.constant dense<0xFF800000> : vector<8x8xf32>
    %36 = vector.multi_reduction <maximumf>, %35, %cst_16 [2] : vector<8x8x8xf32> to vector<8x8xf32>
    %37 = vector.shape_cast %36 : vector<8x8xf32> to vector<8x8x1xf32>
    %38 = vector.broadcast %37 : vector<8x8x1xf32> to vector<8x8x8xf32>
    %39 = arith.subf %35, %38 : vector<8x8x8xf32>
    %40 = math.exp %39 : vector<8x8x8xf32>
    %cst_17 = arith.constant dense<0.000000e+00> : vector<8x8xf32>
    %41 = vector.multi_reduction <add>, %40, %cst_17 [2] : vector<8x8x8xf32> to vector<8x8xf32>
    %42 = vector.shape_cast %41 : vector<8x8xf32> to vector<8x8x1xf32>
    %43 = tpu.reciprocal %42 : vector<8x8x1xf32> -> vector<8x8x1xf32>
    %44 = vector.broadcast %43 : vector<8x8x1xf32> to vector<8x8x8xf32>
    %45 = arith.mulf %40, %44 : vector<8x8x8xf32>
    %cst_18 = arith.constant dense<0.000000e+00> : vector<8x8xf32>
    %46 = vector.multi_reduction <add>, %45, %cst_18 [0] : vector<8x8x8xf32> to vector<8x8xf32>
    %cst_19 = arith.constant dense<0.000000e+00> : vector<8xf32>
    %47 = vector.multi_reduction <add>, %46, %cst_19 [0] : vector<8x8xf32> to vector<8xf32>
    %48 = vector.shape_cast %47 : vector<8xf32> to vector<1x8xf32>
    %49 = arith.addf %29, %48 : vector<1x8xf32>
    "tpu.trace_start"() <{level = 10 : i32, message = "bqk,bkd->bqd"}> : () -> ()
    %cst_20 = arith.constant dense<0.000000e+00> : vector<8x8x8xf32>
    %50 = tpu.matmul %45, %32, %cst_20 {dimension_numbers = #tpu.dot_dimension_numbers<[2], [1], [1], [2], [0, 0, 0, 1, 1, 2], [0], [0]>} : vector<8x8x8xf32>, vector<8x8x8xf32>, vector<8x8x8xf32> -> vector<8x8x8xf32>
    "tpu.trace_stop"() : () -> ()
    %51 = vector.shape_cast %50 : vector<8x8x8xf32> to vector<64x8xf32>
    %c0_21 = arith.constant 0 : index
    %c0_22 = arith.constant 0 : index
    %c0_23 = arith.constant 0 : index
    %52 = vector.load %arg5[%c0_21, %c0_22, %c0_23] : memref<4x8x32xf32, #tpu.memory_space<vmem>>, vector<1x8x32xf32>
    %53 = vector.shape_cast %52 : vector<1x8x32xf32> to vector<8x32xf32>
    %cst_24 = arith.constant dense<0.000000e+00> : vector<64x32xf32>
    %54 = tpu.matmul %51, %53, %cst_24 {dimension_numbers = #tpu.dot_dimension_numbers<[1], [0], [0], [1], [0, 0, 1, 1], [], []>} : vector<64x8xf32>, vector<8x32xf32>, vector<64x32xf32> -> vector<64x32xf32>
    %55 = arith.addf %28, %54 : vector<64x32xf32>
    %56 = vector.extract_strided_slice %27 {offsets = [0, 0, 8], sizes = [8, 8, 8], strides = [1, 1, 1]} : vector<8x8x96xf32> to vector<8x8x8xf32>
    %57 = vector.extract_strided_slice %27 {offsets = [0, 0, 40], sizes = [8, 8, 8], strides = [1, 1, 1]} : vector<8x8x96xf32> to vector<8x8x8xf32>
    %58 = vector.extract_strided_slice %27 {offsets = [0, 0, 72], sizes = [8, 8, 8], strides = [1, 1, 1]} : vector<8x8x96xf32> to vector<8x8x8xf32>
    "tpu.trace_start"() <{level = 10 : i32, message = "bqd,bkd->bqk"}> : () -> ()
    %cst_25 = arith.constant dense<0.000000e+00> : vector<8x8x8xf32>
    %59 = tpu.matmul %56, %57, %cst_25 {dimension_numbers = #tpu.dot_dimension_numbers<[2], [2], [1], [1], [0, 0, 0, 1, 1, 1], [0], [0]>} : vector<8x8x8xf32>, vector<8x8x8xf32>, vector<8x8x8xf32> -> vector<8x8x8xf32>
    "tpu.trace_stop"() : () -> ()
    %cst_26 = arith.constant 0.353553385 : f32
    %60 = vector.broadcast %cst_26 : f32 to vector<8x8x8xf32>
    %61 = arith.mulf %59, %60 : vector<8x8x8xf32>
    %cst_27 = arith.constant dense<0xFF800000> : vector<8x8xf32>
    %62 = vector.multi_reduction <maximumf>, %61, %cst_27 [2] : vector<8x8x8xf32> to vector<8x8xf32>
    %63 = vector.shape_cast %62 : vector<8x8xf32> to vector<8x8x1xf32>
    %64 = vector.broadcast %63 : vector<8x8x1xf32> to vector<8x8x8xf32>
    %65 = arith.subf %61, %64 : vector<8x8x8xf32>
    %66 = math.exp %65 : vector<8x8x8xf32>
    %cst_28 = arith.constant dense<0.000000e+00> : vector<8x8xf32>
    %67 = vector.multi_reduction <add>, %66, %cst_28 [2] : vector<8x8x8xf32> to vector<8x8xf32>
    %68 = vector.shape_cast %67 : vector<8x8xf32> to vector<8x8x1xf32>
    %69 = tpu.reciprocal %68 : vector<8x8x1xf32> -> vector<8x8x1xf32>
    %70 = vector.broadcast %69 : vector<8x8x1xf32> to vector<8x8x8xf32>
    %71 = arith.mulf %66, %70 : vector<8x8x8xf32>
    %cst_29 = arith.constant dense<0.000000e+00> : vector<8x8xf32>
    %72 = vector.multi_reduction <add>, %71, %cst_29 [0] : vector<8x8x8xf32> to vector<8x8xf32>
    %cst_30 = arith.constant dense<0.000000e+00> : vector<8xf32>
    %73 = vector.multi_reduction <add>, %72, %cst_30 [0] : vector<8x8xf32> to vector<8xf32>
    %74 = vector.shape_cast %73 : vector<8xf32> to vector<1x8xf32>
    %75 = arith.addf %49, %74 : vector<1x8xf32>
    "tpu.trace_start"() <{level = 10 : i32, message = "bqk,bkd->bqd"}> : () -> ()
    %cst_31 = arith.constant dense<0.000000e+00> : vector<8x8x8xf32>
    %76 = tpu.matmul %71, %58, %cst_31 {dimension_numbers = #tpu.dot_dimension_numbers<[2], [1], [1], [2], [0, 0, 0, 1, 1, 2], [0], [0]>} : vector<8x8x8xf32>, vector<8x8x8xf32>, vector<8x8x8xf32> -> vector<8x8x8xf32>
    "tpu.trace_stop"() : () -> ()
    %77 = vector.shape_cast %76 : vector<8x8x8xf32> to vector<64x8xf32>
    %c1 = arith.constant 1 : index
    %c0_32 = arith.constant 0 : index
    %c0_33 = arith.constant 0 : index
    %78 = vector.load %arg5[%c1, %c0_32, %c0_33] : memref<4x8x32xf32, #tpu.memory_space<vmem>>, vector<1x8x32xf32>
    %79 = vector.shape_cast %78 : vector<1x8x32xf32> to vector<8x32xf32>
    %cst_34 = arith.constant dense<0.000000e+00> : vector<64x32xf32>
    %80 = tpu.matmul %77, %79, %cst_34 {dimension_numbers = #tpu.dot_dimension_numbers<[1], [0], [0], [1], [0, 0, 1, 1], [], []>} : vector<64x8xf32>, vector<8x32xf32>, vector<64x32xf32> -> vector<64x32xf32>
    %81 = arith.addf %55, %80 : vector<64x32xf32>
    %82 = vector.extract_strided_slice %27 {offsets = [0, 0, 16], sizes = [8, 8, 8], strides = [1, 1, 1]} : vector<8x8x96xf32> to vector<8x8x8xf32>
    %83 = vector.extract_strided_slice %27 {offsets = [0, 0, 48], sizes = [8, 8, 8], strides = [1, 1, 1]} : vector<8x8x96xf32> to vector<8x8x8xf32>
    %84 = vector.extract_strided_slice %27 {offsets = [0, 0, 80], sizes = [8, 8, 8], strides = [1, 1, 1]} : vector<8x8x96xf32> to vector<8x8x8xf32>
    "tpu.trace_start"() <{level = 10 : i32, message = "bqd,bkd->bqk"}> : () -> ()
    %cst_35 = arith.constant dense<0.000000e+00> : vector<8x8x8xf32>
    %85 = tpu.matmul %82, %83, %cst_35 {dimension_numbers = #tpu.dot_dimension_numbers<[2], [2], [1], [1], [0, 0, 0, 1, 1, 1], [0], [0]>} : vector<8x8x8xf32>, vector<8x8x8xf32>, vector<8x8x8xf32> -> vector<8x8x8xf32>
    "tpu.trace_stop"() : () -> ()
    %cst_36 = arith.constant 0.353553385 : f32
    %86 = vector.broadcast %cst_36 : f32 to vector<8x8x8xf32>
    %87 = arith.mulf %85, %86 : vector<8x8x8xf32>
    %cst_37 = arith.constant dense<0xFF800000> : vector<8x8xf32>
    %88 = vector.multi_reduction <maximumf>, %87, %cst_37 [2] : vector<8x8x8xf32> to vector<8x8xf32>
    %89 = vector.shape_cast %88 : vector<8x8xf32> to vector<8x8x1xf32>
    %90 = vector.broadcast %89 : vector<8x8x1xf32> to vector<8x8x8xf32>
    %91 = arith.subf %87, %90 : vector<8x8x8xf32>
    %92 = math.exp %91 : vector<8x8x8xf32>
    %cst_38 = arith.constant dense<0.000000e+00> : vector<8x8xf32>
    %93 = vector.multi_reduction <add>, %92, %cst_38 [2] : vector<8x8x8xf32> to vector<8x8xf32>
    %94 = vector.shape_cast %93 : vector<8x8xf32> to vector<8x8x1xf32>
    %95 = tpu.reciprocal %94 : vector<8x8x1xf32> -> vector<8x8x1xf32>
    %96 = vector.broadcast %95 : vector<8x8x1xf32> to vector<8x8x8xf32>
    %97 = arith.mulf %92, %96 : vector<8x8x8xf32>
    %cst_39 = arith.constant dense<0.000000e+00> : vector<8x8xf32>
    %98 = vector.multi_reduction <add>, %97, %cst_39 [0] : vector<8x8x8xf32> to vector<8x8xf32>
    %cst_40 = arith.constant dense<0.000000e+00> : vector<8xf32>
    %99 = vector.multi_reduction <add>, %98, %cst_40 [0] : vector<8x8xf32> to vector<8xf32>
    %100 = vector.shape_cast %99 : vector<8xf32> to vector<1x8xf32>
    %101 = arith.addf %75, %100 : vector<1x8xf32>
    "tpu.trace_start"() <{level = 10 : i32, message = "bqk,bkd->bqd"}> : () -> ()
    %cst_41 = arith.constant dense<0.000000e+00> : vector<8x8x8xf32>
    %102 = tpu.matmul %97, %84, %cst_41 {dimension_numbers = #tpu.dot_dimension_numbers<[2], [1], [1], [2], [0, 0, 0, 1, 1, 2], [0], [0]>} : vector<8x8x8xf32>, vector<8x8x8xf32>, vector<8x8x8xf32> -> vector<8x8x8xf32>
    "tpu.trace_stop"() : () -> ()
    %103 = vector.shape_cast %102 : vector<8x8x8xf32> to vector<64x8xf32>
    %c2 = arith.constant 2 : index
    %c0_42 = arith.constant 0 : index
    %c0_43 = arith.constant 0 : index
    %104 = vector.load %arg5[%c2, %c0_42, %c0_43] : memref<4x8x32xf32, #tpu.memory_space<vmem>>, vector<1x8x32xf32>
    %105 = vector.shape_cast %104 : vector<1x8x32xf32> to vector<8x32xf32>
    %cst_44 = arith.constant dense<0.000000e+00> : vector<64x32xf32>
    %106 = tpu.matmul %103, %105, %cst_44 {dimension_numbers = #tpu.dot_dimension_numbers<[1], [0], [0], [1], [0, 0, 1, 1], [], []>} : vector<64x8xf32>, vector<8x32xf32>, vector<64x32xf32> -> vector<64x32xf32>
    %107 = arith.addf %81, %106 : vector<64x32xf32>
    %108 = vector.extract_strided_slice %27 {offsets = [0, 0, 24], sizes = [8, 8, 8], strides = [1, 1, 1]} : vector<8x8x96xf32> to vector<8x8x8xf32>
    %109 = vector.extract_strided_slice %27 {offsets = [0, 0, 56], sizes = [8, 8, 8], strides = [1, 1, 1]} : vector<8x8x96xf32> to vector<8x8x8xf32>
    %110 = vector.extract_strided_slice %27 {offsets = [0, 0, 88], sizes = [8, 8, 8], strides = [1, 1, 1]} : vector<8x8x96xf32> to vector<8x8x8xf32>
    "tpu.trace_start"() <{level = 10 : i32, message = "bqd,bkd->bqk"}> : () -> ()
    %cst_45 = arith.constant dense<0.000000e+00> : vector<8x8x8xf32>
    %111 = tpu.matmul %108, %109, %cst_45 {dimension_numbers = #tpu.dot_dimension_numbers<[2], [2], [1], [1], [0, 0, 0, 1, 1, 1], [0], [0]>} : vector<8x8x8xf32>, vector<8x8x8xf32>, vector<8x8x8xf32> -> vector<8x8x8xf32>
    "tpu.trace_stop"() : () -> ()
    %cst_46 = arith.constant 0.353553385 : f32
    %112 = vector.broadcast %cst_46 : f32 to vector<8x8x8xf32>
    %113 = arith.mulf %111, %112 : vector<8x8x8xf32>
    %cst_47 = arith.constant dense<0xFF800000> : vector<8x8xf32>
    %114 = vector.multi_reduction <maximumf>, %113, %cst_47 [2] : vector<8x8x8xf32> to vector<8x8xf32>
    %115 = vector.shape_cast %114 : vector<8x8xf32> to vector<8x8x1xf32>
    %116 = vector.broadcast %115 : vector<8x8x1xf32> to vector<8x8x8xf32>
    %117 = arith.subf %113, %116 : vector<8x8x8xf32>
    %118 = math.exp %117 : vector<8x8x8xf32>
    %cst_48 = arith.constant dense<0.000000e+00> : vector<8x8xf32>
    %119 = vector.multi_reduction <add>, %118, %cst_48 [2] : vector<8x8x8xf32> to vector<8x8xf32>
    %120 = vector.shape_cast %119 : vector<8x8xf32> to vector<8x8x1xf32>
    %121 = tpu.reciprocal %120 : vector<8x8x1xf32> -> vector<8x8x1xf32>
    %122 = vector.broadcast %121 : vector<8x8x1xf32> to vector<8x8x8xf32>
    %123 = arith.mulf %118, %122 : vector<8x8x8xf32>
    %cst_49 = arith.constant dense<0.000000e+00> : vector<8x8xf32>
    %124 = vector.multi_reduction <add>, %123, %cst_49 [0] : vector<8x8x8xf32> to vector<8x8xf32>
    %cst_50 = arith.constant dense<0.000000e+00> : vector<8xf32>
    %125 = vector.multi_reduction <add>, %124, %cst_50 [0] : vector<8x8xf32> to vector<8xf32>
    %126 = vector.shape_cast %125 : vector<8xf32> to vector<1x8xf32>
    %127 = arith.addf %101, %126 : vector<1x8xf32>
    "tpu.trace_start"() <{level = 10 : i32, message = "bqk,bkd->bqd"}> : () -> ()
    %cst_51 = arith.constant dense<0.000000e+00> : vector<8x8x8xf32>
    %128 = tpu.matmul %123, %110, %cst_51 {dimension_numbers = #tpu.dot_dimension_numbers<[2], [1], [1], [2], [0, 0, 0, 1, 1, 2], [0], [0]>} : vector<8x8x8xf32>, vector<8x8x8xf32>, vector<8x8x8xf32> -> vector<8x8x8xf32>
    "tpu.trace_stop"() : () -> ()
    %129 = vector.shape_cast %128 : vector<8x8x8xf32> to vector<64x8xf32>
    %c3 = arith.constant 3 : index
    %c0_52 = arith.constant 0 : index
    %c0_53 = arith.constant 0 : index
    %130 = vector.load %arg5[%c3, %c0_52, %c0_53] : memref<4x8x32xf32, #tpu.memory_space<vmem>>, vector<1x8x32xf32>
    %131 = vector.shape_cast %130 : vector<1x8x32xf32> to vector<8x32xf32>
    %cst_54 = arith.constant dense<0.000000e+00> : vector<64x32xf32>
    %132 = tpu.matmul %129, %131, %cst_54 {dimension_numbers = #tpu.dot_dimension_numbers<[1], [0], [0], [1], [0, 0, 1, 1], [], []>} : vector<64x8xf32>, vector<8x32xf32>, vector<64x32xf32> -> vector<64x32xf32>
    %133 = arith.addf %107, %132 : vector<64x32xf32>
    %c0_55 = arith.constant 0 : index
    %c0_56 = arith.constant 0 : index
    %134 = vector.load %arg6[%c0_55, %c0_56] : memref<1x32xf32, #tpu.memory_space<vmem>>, vector<1x32xf32>
    %135 = vector.broadcast %134 : vector<1x32xf32> to vector<64x32xf32>
    %136 = arith.addf %133, %135 : vector<64x32xf32>
    %c0_57 = arith.constant 0 : index
    %c0_58 = arith.constant 0 : index
    %137 = vector.load %arg7[%c0_57, %c0_58] : memref<64x32xf32, #tpu.memory_space<vmem>>, vector<64x32xf32>
    tpu.vector_store %arg7[%c0_57, %c0_58], %136 {strides = array<i32>} : memref<64x32xf32, #tpu.memory_space<vmem>>, vector<64x32xf32>,
    %c0_59 = arith.constant 0 : index
    %c0_60 = arith.constant 0 : index
    %c0_61 = arith.constant 0 : index
    %138 = vector.load %arg8[%c0_59, %c0_60, %c0_61] : memref<1x1x8xf32, #tpu.memory_space<vmem>>, vector<1x1x8xf32>
    %139 = vector.shape_cast %138 : vector<1x1x8xf32> to vector<1x8xf32>
    %140 = vector.shape_cast %127 : vector<1x8xf32> to vector<1x1x8xf32>
    tpu.vector_store %arg8[%c0_59, %c0_60, %c0_61], %140 {strides = array<i32>} : memref<1x1x8xf32, #tpu.memory_space<vmem>>, vector<1x1x8xf32>,
    return
  }
  func.func @transform_0(%arg0: i32) -> (i32, i32) {
    %c0_i32 = arith.constant 0 : i32
    %c0_i32_0 = arith.constant 0 : i32
    return %arg0, %c0_i32 : i32, i32
  }
  func.func @transform_1(%arg0: i32) -> (i32, i32) {
    %c0_i32 = arith.constant 0 : i32
    %c0_i32_0 = arith.constant 0 : i32
    %c0_i32_1 = arith.constant 0 : i32
    return %c0_i32, %c0_i32_0 : i32, i32
  }
  func.func @transform_2(%arg0: i32) -> (i32, i32) {
    %c0_i32 = arith.constant 0 : i32
    %c0_i32_0 = arith.constant 0 : i32
    %c0_i32_1 = arith.constant 0 : i32
    return %c0_i32, %c0_i32_0 : i32, i32
  }
  func.func @transform_3(%arg0: i32) -> (i32, i32) {
    %c0_i32 = arith.constant 0 : i32
    %c0_i32_0 = arith.constant 0 : i32
    %c0_i32_1 = arith.constant 0 : i32
    return %c0_i32, %c0_i32_0 : i32, i32
  }
  func.func @transform_4(%arg0: i32) -> (i32, i32, i32) {
    %c0_i32 = arith.constant 0 : i32
    %c0_i32_0 = arith.constant 0 : i32
    %c0_i32_1 = arith.constant 0 : i32
    %c0_i32_2 = arith.constant 0 : i32
    return %c0_i32, %c0_i32_0, %c0_i32_1 : i32, i32, i32
  }
  func.func @transform_5(%arg0: i32) -> (i32, i32) {
    %c0_i32 = arith.constant 0 : i32
    %c0_i32_0 = arith.constant 0 : i32
    %c0_i32_1 = arith.constant 0 : i32
    return %c0_i32, %c0_i32_0 : i32, i32
  }
  func.func @transform_6(%arg0: i32) -> (i32, i32) {
    %c0_i32 = arith.constant 0 : i32
    %c0_i32_0 = arith.constant 0 : i32
    return %arg0, %c0_i32 : i32, i32
  }
  func.func @transform_7(%arg0: i32) -> (i32, i32, i32) {
    %c0_i32 = arith.constant 0 : i32
    %c0_i32_0 = arith.constant 0 : i32
    %c0_i32_1 = arith.constant 0 : i32
    return %arg0, %c0_i32, %c0_i32_0 : i32, i32, i32
  }
}

</mosaic_0001>

<bundles_post_ra>
// kernel: tpu_custom_call.1
= control target key start
LH: loop header
LB: loop body
LE: loop exit
PB: predicated region body
PF: predicated region fallthrough
CT: control target
= control target key end

     0   :  { %13 = vsyncpa [#allocation3], 0  ;;  %s8776_s0 = inlined_call_operand.vmem [shape: f32[128,32], index: 0, kind: input, shape index: {}]   ;;  %s8777_s1 = inlined_call_operand.vmem [shape: f32[1,32], index: 1, kind: input, shape index: {}]   ;;  %s8778_s2 = inlined_call_operand.vmem [shape: f32[1,32], index: 2, kind: input, shape index: {}]   ;;  %s8779_s3 = inlined_call_operand.vmem [shape: f32[32,96], index: 3, kind: input, shape index: {}]   ;;  %s8780_s4 = inlined_call_operand.vmem [shape: f32[4,8,32], index: 4, kind: input, shape index: {}]   ;;  %s8781_s5 = inlined_call_operand.vmem [shape: f32[1,32], index: 5, kind: input, shape index: {}]   ;;  %s8782_s6 = inlined_call_operand.vmem [shape: f32[128,32], index: 6, kind: output, shape index: {0}]   ;;  %s8783_s7 = inlined_call_operand.hbm [shape: f32[2,1,8], index: 7, kind: output, shape index: {1}]  }
   0x1   :  { %15 = vsyncpa [#allocation3 + $0x1], 0  ;;  %s7703_s24 = smov 0   ;;  %s7705_s25 = smov 0  }
   0x2   :  { %s7707_s26 = smov 0   ;;  %s7709_s27 = smov 0  }
   0x3 LB: > { %s7724_s28 = sadd.s32 4294967295, %s7647_s27   ;;  %s6632_s29 = sadd.s32 4294967294, %s7647_s27   ;;  %s7647_s27 = sphi %s7709_s27, %s8789_s27   ;;  %s7643_s26 = sphi %s7707_s26, %s8788_s26   ;;  %s7639_s25 = sphi %s7705_s25, %s8787_s25   ;;  %s7635_s24 = sphi %s7703_s24, %s8786_s24  }
   0x4   : > { %s7728_s30 = sadd.s32 1, %s7647_s27   ;;  %s185_s8 = sadd.s32 1, %s7643_s26 }
   0x5   : > { %s182_s9 = ssub.s32 %s7647_s27, %s7728_s30  ;;  %p195_p0 = scmp.ne.s32.totalorder %s7643_s26, %s7639_s25 }
   0x6   : > { %p183_p1 = scmp.eq.s32.totalorder %s182_s9, 0  ;;  %p196_p2 = scmp.eq.s32.totalorder %s7724_s28, 1 }
   0x7   : > { %p201_p3 = scmp.ne.s32.totalorder %s7639_s25, %s7635_s24  ;;  %p202_p4 = scmp.eq.s32.totalorder %s6632_s29, 1 }
   0x8   : > { %s7739_s10 = scalar_select %p183_p1, %s7643_s26, %s185_s8  }
   0x9   : > { %p7741_p5 = por %p196_p2, %p195_p0  ;;  %p7745_p6 = por %p202_p4, %p201_p3 }
   0xa   : > { %p6635_p7 = scmp.ge.s32.totalorder %s7647_s27, 1  ;;  %p244_p8 = scmp.lt.s32.totalorder %s7647_s27, 3 }
   0xc   : > { %p245_p9 = pnand %p6635_p7, %p244_p8 }
   0xd   : > { %s6636_s13 = sshll.u32 (!%p245_p9), %s7724_s28, 3  ;;  %vm300_vm0 = vcmask (!%p245_p9), 261120   ;;  %v436_v56 = vld [vmem:[%s8779_s3] sm:$0xff] (!%p245_p9)  ;;  %v437_v57 = vld [vmem:[%s8779_s3 + $0x8] sm:$0xff] (!%p245_p9)  ;;  %v438_v59 = vld [vmem:[%s8779_s3 + $0x10] sm:$0xff] (!%p245_p9)  ;;  %vm7650_vm1 = vmmov (!%p245_p9), 0  }
   0xe   : > { %248 = sbr.rel (%p245_p9) target bundleno = 3591 (0xe07), region = 44  ;;  %p281_p10 = scmp.lt.s32.totalorder (!%p245_p9), %s6636_s13, 15  ;;  %v7357_v58 = vpack.c.bf16 (!%p245_p9), %v437_v57, %v436_v56  ;;  %v439_v60 = vld [vmem:[%s8779_s3 + $0x18] sm:$0xff] (!%p245_p9)  ;;  %vm572_vm2 = vcmask (!%p245_p9), 64512   ;;  %vm6528_vm3 = vcmask (!%p245_p9), 57344  }
   0xf   : > { %v7361_v61 = vpack.c.bf16 (!%p245_p9), %v439_v60, %v438_v59  ;;  %s7651_s18 = smov (!%p245_p9), 96   ;;  %s7652_s19 = smov (!%p245_p9), 64  }
  0x10   : > { %7358 = vmatprep.subr.bf16.mxu0 (!%p245_p9), %v7357_v58  ;;  %s7653_s20 = smov (!%p245_p9), 120   ;;  %s7654_s21 = smov (!%p245_p9), 88  }
  0x11   : > { %7360 = vmatpush3.bf16.msra.mxu0 (!%p245_p9), %v7357_v58  ;;  %s7655_s22 = smov (!%p245_p9), 56   ;;  %s7656_s23 = smov (!%p245_p9), 112  }
  0x12   : > { %7362 = vmatprep.subr.bf16.mxu0 (!%p245_p9), %v7361_v61  ;;  %s7657_s29 = smov (!%p245_p9), 80   ;;  %s7658_s8 = smov (!%p245_p9), 48  }
  0x13   : > { %s7662_s15 = smov (!%p245_p9), [#allocation2]  }
  0x14   : > { %s7589_s16 = sshll.u32 (!%p245_p9), %s7662_s15, 4  ;;  %s7590_s16 = int_to_ptr.vmem [resolvable:$false] %s7589_s16 }
  0x15   : > { %s8791_s13 = smov (!%p281_p10, %s6636_s13), 15  ;;  %7364 = vmatpush3.bf16.msra.mxu0 %v7361_v61 }
  0x16   : > { %s6637_s14 = sshll.u32 %s8791_s13, 3  ;;  %s6782_s13 = sshll.u32 %s7724_s28, 4 }
  0x17   : > { %s284_s17 = scalar_lea.vmem %s8776_s0, %s6637_s14 }
  0x18   : > { %v292_v0 = vld [vmem:[%s284_s17] sm:$0xff]  ;;  %v294_v1 = vld [vmem:[%s284_s17 + $0x10] sm:$0xff]  ;;  %v293_v2 = vld [vmem:[%s284_s17 + $0x8] sm:$0xff] }
  0x19   : > { %v301_v3 = vsel %vm300_vm0, %v292_v0, 0.0  ;;  %v307_v4 = vsel %vm300_vm0, %v294_v1, 0.0  ;;  %v295_v5 = vld [vmem:[%s284_s17 + $0x18] sm:$0xff]  ;;  %v304_v6 = vsel %vm300_vm0, %v293_v2, 0.0  ;;  %v296_v8 = vld [vmem:[%s284_s17 + $0x20] sm:$0xff]  ;;  %v297_v9 = vld [vmem:[%s284_s17 + $0x28] sm:$0xff] }
  0x1a   : > { %302 = vadd.xlane.f32.xlu0 %v301_v3  ;;  %308 = vadd.xlane.f32.xlu1 %v307_v4  ;;  %v310_v7 = vsel %vm300_vm0, %v295_v5, 0.0  ;;  %v313_v10 = vsel %vm300_vm0, %v296_v8, 0.0  ;;  %v316_v11 = vsel %vm300_vm0, %v297_v9, 0.0  ;;  %v298_v12 = vld [vmem:[%s284_s17 + $0x30] sm:$0xff]  ;;  %v299_v13 = vld [vmem:[%s284_s17 + $0x38] sm:$0xff]  ;;  %s7591_s17 = scalar_lea.vmem %s7590_s16, 32 }
  0x1b   : > { %v319_v14 = vsel %vm300_vm0, %v298_v12, 0.0  ;;  %v322_v15 = vsel %vm300_vm0, %v299_v13, 0.0 }
  0x1e   : > { %305 = vadd.xlane.f32.xlu0 %v304_v6  ;;  %311 = vadd.xlane.f32.xlu1 %v310_v7 }
  0x22   : > { %314 = vadd.xlane.f32.xlu0 %v313_v10  ;;  %317 = vadd.xlane.f32.xlu1 %v316_v11 }
  0x26   : > { %320 = vadd.xlane.f32.xlu0 %v319_v14  ;;  %323 = vadd.xlane.f32.xlu1 %v322_v15 }
  0xa7   : > { %v303_v16 = vpop.xlane.xlu0 %302  ;;  %v309_v17 = vpop.xlane.xlu1 %308 }
  0xa8   : > { %v326_v18 = vmul.f32 0.03125, %v303_v16  ;;  %v328_v19 = vmul.f32 0.03125, %v309_v17 }
  0xaa   : > { %v7768_v20 = vsub.f32 %v292_v0, %v326_v18  ;;  %v7770_v21 = vsub.f32 %v294_v1, %v328_v19 }
  0xab   : > { %v306_v22 = vpop.xlane.xlu0 %305  ;;  %v312_v23 = vpop.xlane.xlu1 %311 }
  0xac   : > { %v327_v24 = vmul.f32 0.03125, %v306_v22  ;;  %v329_v25 = vmul.f32 0.03125, %v312_v23  ;;  %v342_v26 = vmul.f32 %v7768_v20, %v7768_v20  ;;  %v344_v27 = vmul.f32 %v7770_v21, %v7770_v21  ;;  %v6640_v22 = vld [vmem:[%s8777_s1] ss:$0 sm:$0xff] }
  0xae   : > { %v7776_v28 = vsub.f32 %v293_v2, %v327_v24  ;;  %v7778_v29 = vsub.f32 %v295_v5, %v329_v25  ;;  %v350_v30 = vsel %vm300_vm0, %v342_v26, 0.0  ;;  %v356_v33 = vsel %vm300_vm0, %v344_v27, 0.0  ;;  %v6641_v26 = vld [vmem:[%s8778_s2] ss:$0 sm:$0xff] }
  0xaf   : > { %351 = vadd.xlane.f32.xlu0 %v350_v30  ;;  %v315_v31 = vpop.xlane.xlu0 %314  ;;  %v318_v32 = vpop.xlane.xlu1 %317 }
  0xb0   : > { %v330_v34 = vmul.f32 0.03125, %v315_v31  ;;  %v331_v35 = vmul.f32 0.03125, %v318_v32  ;;  %v343_v36 = vmul.f32 %v7776_v28, %v7776_v28  ;;  %v345_v37 = vmul.f32 %v7778_v29, %v7778_v29 }
  0xb2   : > { %v7786_v38 = vsub.f32 %v296_v8, %v330_v34  ;;  %v7788_v39 = vsub.f32 %v297_v9, %v331_v35  ;;  %v353_v40 = vsel %vm300_vm0, %v343_v36, 0.0  ;;  %v359_v43 = vsel %vm300_vm0, %v345_v37, 0.0 }
  0xb3   : > { %357 = vadd.xlane.f32.xlu0 %v356_v33  ;;  %354 = vadd.xlane.f32.xlu1 %v353_v40  ;;  %v321_v41 = vpop.xlane.xlu0 %320  ;;  %v324_v42 = vpop.xlane.xlu1 %323 }
  0xb4   : > { %v332_v44 = vmul.f32 0.03125, %v321_v41  ;;  %v333_v45 = vmul.f32 0.03125, %v324_v42  ;;  %v346_v46 = vmul.f32 %v7786_v38, %v7786_v38  ;;  %v347_v47 = vmul.f32 %v7788_v39, %v7788_v39 }
  0xb6   : > { %v7796_v48 = vsub.f32 %v298_v12, %v332_v44  ;;  %v7798_v49 = vsub.f32 %v299_v13, %v333_v45  ;;  %v362_v50 = vsel %vm300_vm0, %v346_v46, 0.0  ;;  %v365_v51 = vsel %vm300_vm0, %v347_v47, 0.0 }
  0xb7   : > { %360 = vadd.xlane.f32.xlu1 %v359_v43  ;;  %363 = vadd.xlane.f32.xlu0 %v362_v50 }
  0xb8   : > { %v348_v52 = vmul.f32 %v7796_v48, %v7796_v48  ;;  %v349_v53 = vmul.f32 %v7798_v49, %v7798_v49 }
  0xba   : > { %v368_v54 = vsel %vm300_vm0, %v348_v52, 0.0  ;;  %v371_v55 = vsel %vm300_vm0, %v349_v53, 0.0 }
  0xbb   : > { %366 = vadd.xlane.f32.xlu1 %v365_v51  ;;  %369 = vadd.xlane.f32.xlu0 %v368_v54 }
  0xbf   : > { %372 = vadd.xlane.f32.xlu1 %v371_v55 }
 0x13c   : > { %v352_v62 = vpop.xlane.xlu0 %351 }
 0x13d   : > { %v374_v63 = vmul.f32 0.03125, %v352_v62 }
 0x13f   : > { %v382_v0 = vadd.f32 1e-05, %v374_v63 }
 0x140   : > { %v355_v1 = vpop.xlane.xlu1 %354  ;;  %v358_v2 = vpop.xlane.xlu0 %357 }
 0x141   : > { %7441 = vrsqrt.f32 %v382_v0  ;;  %v375_v3 = vmul.f32 0.03125, %v355_v1  ;;  %v376_v4 = vmul.f32 0.03125, %v358_v2 }
 0x143   : > { %v383_v5 = vadd.f32 1e-05, %v375_v3  ;;  %v384_v6 = vadd.f32 1e-05, %v376_v4 }
 0x144   : > { %v361_v7 = vpop.xlane.xlu1 %360  ;;  %v364_v8 = vpop.xlane.xlu0 %363 }
 0x145   : > { %7443 = vrsqrt.f32 %v383_v5  ;;  %v377_v9 = vmul.f32 0.03125, %v361_v7  ;;  %v378_v10 = vmul.f32 0.03125, %v364_v8 }
 0x146   : > { %7445 = vrsqrt.f32 %v384_v6 }
 0x147   : > { %v385_v11 = vadd.f32 1e-05, %v377_v9  ;;  %v386_v12 = vadd.f32 1e-05, %v378_v10 }
 0x148   : > { %v367_v13 = vpop.xlane.xlu1 %366  ;;  %v370_v14 = vpop.xlane.xlu0 %369 }
 0x149   : > { %7447 = vrsqrt.f32 %v385_v11  ;;  %v379_v15 = vmul.f32 0.03125, %v367_v13  ;;  %v380_v16 = vmul.f32 0.03125, %v370_v14 }
 0x14a   : > { %7449 = vrsqrt.f32 %v386_v12 }
 0x14b   : > { %v7442_v17 = vpop.eup %7441  ;;  %v387_v18 = vadd.f32 1e-05, %v379_v15  ;;  %v388_v19 = vadd.f32 1e-05, %v380_v16 }
 0x14c   : > { %v373_v23 = vpop.xlane.xlu1 %372  ;;  %v398_v24 = vmul.f32 %v7442_v17, %v7768_v20 }
 0x14d   : > { %7451 = vrsqrt.f32 %v387_v18  ;;  %v381_v25 = vmul.f32 0.03125, %v373_v23 }
 0x14e   : > { %7453 = vrsqrt.f32 %v388_v19  ;;  %v413_v27 = vmul.f32 %v6640_v22, %v398_v24 }
 0x14f   : > { %v7444_v30 = vpop.eup %7443  ;;  %v389_v31 = vadd.f32 1e-05, %v381_v25 }
 0x150   : > { %v7446_v32 = vpop.eup %7445  ;;  %v428_v33 = vadd.f32 %v6641_v26, %v413_v27  ;;  %v399_v34 = vmul.f32 %v7444_v30, %v7776_v28 }
 0x151   : > { %7455 = vrsqrt.f32 %v389_v31  ;;  %v400_v35 = vmul.f32 %v7446_v32, %v7770_v21 }
 0x152   : > { %6969 = vmatprep.mubr.msk.f32.mxu0 %vm300_vm0, %v428_v33  ;;  %v414_v20 = vmul.f32 %v6640_v22, %v399_v34 }
 0x153   : > { %v7448_v36 = vpop.eup %7447  ;;  %v415_v37 = vmul.f32 %v6640_v22, %v400_v35 }
 0x154   : > { %v7450_v40 = vpop.eup %7449  ;;  %v429_v41 = vadd.f32 %v6641_v26, %v414_v20  ;;  %v401_v42 = vmul.f32 %v7448_v36, %v7778_v29 }
 0x155   : > { %v430_v43 = vadd.f32 %v6641_v26, %v415_v37  ;;  %v402_v44 = vmul.f32 %v7450_v40, %v7786_v38 }
 0x156   : > { %6970 = vmatmul.mubr.msk.f32.vlgmr.msra.gmra.mrb[0].mxu0 %vm300_vm0, %v429_v41  ;;  %v416_v45 = vmul.f32 %v6640_v22, %v401_v42 }
 0x157   : > { %v7452_v46 = vpop.eup %7451  ;;  %6972 = vmatprep.mubr.msk.f32.mxu0 %vm300_vm0, %v430_v43  ;;  %v417_v28 = vmul.f32 %v6640_v22, %v402_v44 }
 0x158   : > { %v7454_v21 = vpop.eup %7453  ;;  %v431_v47 = vadd.f32 %v6641_v26, %v416_v45  ;;  %v403_v50 = vmul.f32 %v7452_v46, %v7788_v39 }
 0x159   : > { %v432_v51 = vadd.f32 %v6641_v26, %v417_v28  ;;  %v404_v52 = vmul.f32 %v7454_v21, %v7796_v48  ;;  %v7649_v48 = vmov 0.0  }
 0x15a   : > { %6973 = vmatmul.mubr.msk.f32.gmra.mrb[2].mxu0 %vm300_vm0, %v431_v47  ;;  %v418_v29 = vmul.f32 %v6640_v22, %v403_v50  ;;  %6986 = vmatprep.subr.mxu1 %v7649_v48 }
 0x15b   : > { %v7456_v53 = vpop.eup %7455  ;;  %6975 = vmatprep.mubr.msk.f32.mxu0 %vm300_vm0, %v432_v51  ;;  %v419_v38 = vmul.f32 %v6640_v22, %v404_v52  ;;  %6981 = vmatprep.subr.mxu0 %v7649_v48 }
 0x15c   : > { %v433_v54 = vadd.f32 %v6641_v26, %v418_v29  ;;  %v405_v55 = vmul.f32 %v7456_v53, %v7798_v49  ;;  %6988 = vmatprep.mubr.msk.f32.mxu1 %vm7650_vm1, %v7649_v48 }
 0x15d   : > { %v434_v56 = vadd.f32 %v6641_v26, %v419_v38 }
 0x15e   : > { %6976 = vmatmul.mubr.msk.f32.gmra.mrb[4].mxu0 %vm300_vm0, %v433_v54  ;;  %v420_v57 = vmul.f32 %v6640_v22, %v405_v55 }
 0x15f   : > { %6978 = vmatprep.mubr.msk.f32.mxu0 %vm300_vm0, %v434_v56 }
 0x160   : > { %v435_v39 = vadd.f32 %v6641_v26, %v420_v57 }
 0x162   : > { %6979 = vmatmul.mubr.msk.f32.gmra.mrb[6].mxu0 %vm300_vm0, %v435_v39 }
 0x163   : > { %6983 = vmatprep.mubr.msk.f32.mxu0 %vm7650_vm1, %v7649_v48 }
 0x229   : > { %v7848_v49 = vpop.f32.mrb[0].mxu0 }
 0x22a   : > { %648 = vrot.lane.b32.xlu0 %v7848_v49, %s7651_s18  ;;  %v7851_v58 = vpop.f32.mrb[1].mxu0 }
 0x22b   : > { %570 = vrot.lane.b32.xlu1 %v7851_v58, %s7651_s18 }
 0x22d   : > { %v7854_v59 = vpop.f32.mrb[2].mxu0 }
 0x22e   : > { %v7856_v60 = vpop.f32.mrb[3].mxu0 }
 0x22f   : > { %725 = vrot.lane.b32.xlu1 %v7856_v60, %s7651_s18 }
 0x231   : > { %v7859_v61 = vpop.f32.mrb[4].mxu0 }
 0x232   : > { %956 = vrot.lane.b32.xlu0 %v7859_v61, %s7651_s18  ;;  %v7862_v62 = vpop.f32.mrb[5].mxu0 }
 0x233   : > { %802 = vrot.lane.b32.xlu1 %v7854_v59, %s7651_s18 }
 0x235   : > { %v7865_v63 = vpop.f32.mrb[6].mxu0 }
 0x236   : > { %879 = vrot.lane.b32.xlu0 %v7862_v62, %s7651_s18  ;;  %v7868_v0 = vpop.f32.mrb[7].mxu0 }
 0x237   : > { %1110 = vrot.lane.b32.xlu1 %v7865_v63, %s7651_s18 }
 0x23b   : > { %1033 = vrot.lane.b32.xlu1 %v7868_v0, %s7651_s18  ;;  %s7659_s18 = smov 104  }
 0x29c   : > { %v649_v1 = vpop.permute.xlu0 %648 }
 0x29d   : > { %v571_v2 = vpop.permute.xlu1 %570  ;;  %6987 = vmatpush3.xpose.msk.msra.mxu1 %vm572_vm2, %v649_v1 }
 0x29e   : > { %6982 = vmatpush3.xpose.msk.msra.mxu0 %vm572_vm2, %v571_v2  ;;  %6991 = vmatprep.subr.mxu1 %v7649_v48 }
 0x29f   : > { %7006 = vmatprep.subr.mxu0 %v7649_v48 }
 0x2a0   : > { %6989 = vmatmul.mubr.msk.f32.vlgmr.msra.gmra.mrb[0].mxu1 %vm572_vm2, %v7848_v49 }
 0x2a1   : > { %v726_v3 = vpop.permute.xlu1 %725  ;;  %6984 = vmatmul.mubr.msk.f32.vlgmr.msra.gmra.mrb[8].mxu0 %vm572_vm2, %v7851_v58  ;;  %6993 = vmatprep.mubr.msk.f32.mxu1 %vm7650_vm1, %v7649_v48 }
 0x2a2   : > { %6992 = vmatpush3.xpose.msk.msra.mxu1 %vm572_vm2, %v726_v3  ;;  %7008 = vmatprep.mubr.msk.f32.mxu0 %vm7650_vm1, %v7649_v48 }
 0x2a3   : > { %6996 = vmatprep.subr.mxu1 %v7649_v48 }
 0x2a4   : > { %v957_v4 = vpop.permute.xlu0 %956 }
 0x2a5   : > { %v803_v5 = vpop.permute.xlu1 %802  ;;  %6994 = vmatmul.mubr.msk.f32.vlgmr.msra.gmra.mrb[2].mxu1 %vm572_vm2, %v7856_v60  ;;  %7007 = vmatpush3.xpose.msk.msra.mxu0 %vm572_vm2, %v957_v4 }
 0x2a6   : > { %6997 = vmatpush3.xpose.msk.msra.mxu1 %vm572_vm2, %v803_v5  ;;  %6998 = vmatprep.mubr.msk.f32.mxu1 %vm7650_vm1, %v7649_v48 }
 0x2a7   : > { %7001 = vmatprep.subr.mxu1 %v7649_v48  ;;  %7016 = vmatprep.subr.mxu0 %v7649_v48 }
 0x2a8   : > { %7009 = vmatmul.mubr.msk.f32.vlgmr.msra.gmra.mrb[10].mxu0 %vm572_vm2, %v7859_v61  ;;  %v880_v6 = vpop.permute.xlu0 %879 }
 0x2a9   : > { %v1111_v7 = vpop.permute.xlu1 %1110  ;;  %6999 = vmatmul.mubr.msk.f32.vlgmr.msra.gmra.mrb[4].mxu1 %vm572_vm2, %v7854_v59  ;;  %7018 = vmatprep.mubr.msk.f32.mxu0 %vm7650_vm1, %v7649_v48 }
 0x2aa   : > { %7002 = vmatpush3.xpose.msk.msra.mxu1 %vm572_vm2, %v880_v6  ;;  %7017 = vmatpush3.xpose.msk.msra.mxu0 %vm572_vm2, %v1111_v7 }
 0x2ab   : > { %7003 = vmatprep.mubr.msk.f32.mxu1 %vm7650_vm1, %v7649_v48  ;;  %7011 = vmatprep.subr.mxu1 %v7649_v48 }
 0x2ac   : > { %7026 = vmatprep.subr.mxu0 %v7649_v48 }
 0x2ad   : > { %v1034_v8 = vpop.permute.xlu1 %1033  ;;  %7004 = vmatmul.mubr.msk.f32.vlgmr.msra.gmra.mrb[6].mxu1 %vm572_vm2, %v7862_v62  ;;  %7019 = vmatmul.mubr.msk.f32.vlgmr.msra.gmra.mrb[12].mxu0 %vm572_vm2, %v7865_v63 }
 0x2ae   : > { %7012 = vmatpush3.xpose.msk.msra.mxu1 %vm572_vm2, %v1034_v8  ;;  %7013 = vmatprep.mubr.msk.f32.mxu1 %vm7650_vm1, %v7649_v48 }
 0x2af   : > { %7028 = vmatprep.mubr.msk.f32.mxu0 %vm7650_vm1, %v7649_v48  ;;  %7021 = vmatprep.subr.mxu1 %v7649_v48 }
 0x2b1   : > { %7014 = vmatmul.mubr.msk.f32.vlgmr.msra.gmra.mrb[8].mxu1 %vm572_vm2, %v7868_v0 }
 0x2b2   : > { %7023 = vmatprep.mubr.msk.f32.mxu1 %vm7650_vm1, %v7649_v48 }
 0x373   : > { %v720_v9 = vpop.f32.mrb[0].mxu1 }
 0x374   : > { %v1187_v10 = vmul.f32 0.35355338, %v720_v9  ;;  %v7920_v11 = vpop.f32.mrb[8].mxu0  ;;  %v6990_v12 = vpop.f32.mrb[1].mxu1 }
 0x375   : > { %v6985_v13 = vpop.f32.mrb[9].mxu0  ;;  %v1186_v56 = vmul.f32 0.35355338, %v7920_v11 }
 0x376   : > { %v1197_v14 = vsel %vm572_vm2, %v1187_v10, -inf }
 0x377   : > { %1198 = vmax.xlane.f32.xlu0 %v1197_v14  ;;  %v1194_v39 = vsel %vm572_vm2, %v1186_v56, -inf }
 0x378   : > { %v7923_v15 = vpop.f32.mrb[2].mxu1 }
 0x379   : > { %v6995_v16 = vpop.f32.mrb[3].mxu1  ;;  %v7967_v4 = vmul.f32 0.35355338, %v7923_v15 }
 0x37b   : > { %v1028_v17 = vpop.f32.mrb[10].mxu0  ;;  %v1200_v5 = vsel %vm572_vm2, %v7967_v4, -inf }
 0x37c   : > { %v1191_v18 = vmul.f32 0.35355338, %v1028_v17  ;;  %v874_v19 = vpop.f32.mrb[4].mxu1  ;;  %v7010_v22 = vpop.f32.mrb[11].mxu0 }
 0x37d   : > { %v1189_v23 = vmul.f32 0.35355338, %v874_v19  ;;  %v7000_v24 = vpop.f32.mrb[5].mxu1 }
 0x37e   : > { %v1209_v25 = vsel %vm572_vm2, %v1191_v18, -inf }
 0x37f   : > { %1210 = vmax.xlane.f32.xlu0 %v1209_v25  ;;  %v1203_v26 = vsel %vm572_vm2, %v1189_v23, -inf }
 0x380   : > { %1204 = vmax.xlane.f32.xlu1 %v1203_v26  ;;  %v951_v27 = vpop.f32.mrb[6].mxu1  ;;  %v1182_v30 = vpop.f32.mrb[12].mxu0 }
 0x381   : > { %v1193_v31 = vmul.f32 0.35355338, %v1182_v30  ;;  %v7005_v32 = vpop.f32.mrb[7].mxu1  ;;  %v7020_v33 = vpop.f32.mrb[13].mxu0  ;;  %v7951_v57 = vmul.f32 0.35355338, %v951_v27 }
 0x383   : > { %v1215_v34 = vsel %vm572_vm2, %v1193_v31, -inf  ;;  %v1206_v2 = vsel %vm572_vm2, %v7951_v57, -inf }
 0x384   : > { %1216 = vmax.xlane.f32.xlu0 %v1215_v34  ;;  %v1105_v35 = vpop.f32.mrb[8].mxu1 }
 0x385   : > { %v7015_v20 = vpop.f32.mrb[9].mxu1  ;;  %v7956_v1 = vmul.f32 0.35355338, %v1105_v35 }
 0x387   : > { %v1212_v3 = vsel %vm572_vm2, %v7956_v1, -inf }
 0x391   : > { %1533 = vrot.lane.b32.xlu1 %v7854_v59, %s7652_s19 }
 0x395   : > { %1685 = vrot.lane.b32.xlu1 %v7859_v61, %s7652_s19 }
 0x399   : > { %1837 = vrot.lane.b32.xlu1 %v7865_v63, %s7652_s19 }
 0x404   : > { %v1199_v36 = vpop.xlane.xlu0 %1198 }
 0x405   : > { %v1219_v37 = vsub.f32 %v1187_v10, %v1199_v36 }
 0x407   : > { %v1228_v40 = vmul.f32 1.442695, %v1219_v37 }
 0x409   : > { %7457 = vpow2.f32 %v1228_v40 }
 0x40c   : > { %v1211_v41 = vpop.xlane.xlu0 %1210 }
 0x40d   : > { %v1223_v42 = vsub.f32 %v1191_v18, %v1211_v41  ;;  %v1205_v43 = vpop.xlane.xlu1 %1204 }
 0x40e   : > { %v1221_v44 = vsub.f32 %v1189_v23, %v1205_v43 }
 0x40f   : > { %v1236_v45 = vmul.f32 1.442695, %v1223_v42 }
 0x410   : > { %v1232_v46 = vmul.f32 1.442695, %v1221_v44 }
 0x411   : > { %7459 = vpow2.f32 %v1236_v45  ;;  %v1217_v29 = vpop.xlane.xlu0 %1216  ;;  %v1534_v6 = vpop.permute.xlu1 %1533 }
 0x412   : > { %7461 = vpow2.f32 %v1232_v46  ;;  %v1225_v53 = vsub.f32 %v1193_v31, %v1217_v29 }
 0x413   : > { %v7458_v28 = vpop.eup %7457 }
 0x414   : > { %v1245_v21 = vsel %vm572_vm2, %v7458_v28, 0.0  ;;  %v1240_v38 = vmul.f32 1.442695, %v1225_v53 }
 0x415   : > { %1246 = vadd.xlane.f32.xlu0 %v1245_v21  ;;  %v1686_v7 = vpop.permute.xlu1 %1685 }
 0x416   : > { %7463 = vpow2.f32 %v1240_v38 }
 0x419   : > { %v1838_v9 = vpop.permute.xlu1 %1837 }
 0x41b   : > { %v7460_v47 = vpop.eup %7459 }
 0x41c   : > { %v7462_v50 = vpop.eup %7461  ;;  %v1257_v51 = vsel %vm572_vm2, %v7460_v47, 0.0 }
 0x41d   : > { %1258 = vadd.xlane.f32.xlu0 %v1257_v51  ;;  %v1251_v52 = vsel %vm572_vm2, %v7462_v50, 0.0 }
 0x41e   : > { %1252 = vadd.xlane.f32.xlu1 %v1251_v52 }
 0x420   : > { %v7464_v54 = vpop.eup %7463 }
 0x421   : > { %v1263_v55 = vsel %vm572_vm2, %v7464_v54, 0.0 }
 0x42f   : > { %1992 = vrot.lane.b32.xlu1 %v7848_v49, %s7653_s20 }
 0x433   : > { %1381 = vrot.lane.b32.xlu0 %v7848_v49, %s7652_s19 }
 0x437   : > { %1994 = vrot.lane.b32.xlu0 %v7848_v49, %s7654_s21 }
 0x43b   : > { %2150 = vrot.lane.b32.xlu0 %v7854_v59, %s7654_s21 }
 0x43f   : > { %2306 = vrot.lane.b32.xlu0 %v7859_v61, %s7654_s21 }
 0x443   : > { %2462 = vrot.lane.b32.xlu0 %v7865_v63, %s7654_s21 }
 0x453   : > { %1264 = vadd.xlane.f32.xlu1 %v1263_v55 }
 0x462   : > { %1195 = vmax.xlane.f32.xlu0 %v1194_v39 }
 0x464   : > { %2148 = vrot.lane.b32.xlu1 %v7854_v59, %s7653_s20 }
 0x466   : > { %1207 = vmax.xlane.f32.xlu0 %v1206_v2 }
 0x468   : > { %2304 = vrot.lane.b32.xlu1 %v7859_v61, %s7653_s20 }
 0x46a   : > { %1213 = vmax.xlane.f32.xlu0 %v1212_v3 }
 0x46c   : > { %2460 = vrot.lane.b32.xlu1 %v7865_v63, %s7653_s20 }
 0x490   : > { %1201 = vmax.xlane.f32.xlu1 %v1200_v5 }
 0x4a2   : > { %v1247_v8 = vpop.xlane.xlu0 %1246 }
 0x4a3   : > { %7465 = vrcp.f32 %v1247_v8 }
 0x4aa   : > { %v1259_v10 = vpop.xlane.xlu0 %1258 }
 0x4ab   : > { %v1253_v11 = vpop.xlane.xlu1 %1252 }
 0x4ac   : > { %7467 = vrcp.f32 %v1253_v11 }
 0x4ad   : > { %v7466_v12 = vpop.eup %7465  ;;  %7469 = vrcp.f32 %v1259_v10 }
 0x4ae   : > { %v1382_v13 = vpop.permute.xlu0 %1381  ;;  %v7971_v14 = vmul.f32 %v7466_v12, %v7458_v28 }
 0x4af   : > { %7027 = vmatpush3.msra.mxu0 %v1382_v13  ;;  %v1993_v22 = vpop.permute.xlu1 %1992 }
 0x4b0   : > { %7029 = vmatmul.mubr.msk.f32.vlgmr.msra.gmra.mrb[14].mxu0 %vm572_vm2, %v7971_v14  ;;  %7036 = vmatprep.subr.mxu0 %v7649_v48 }
 0x4b1   : > { %7037 = vmatpush3.msra.mxu0 %v1534_v6  ;;  %7038 = vmatprep.mubr.msk.f32.mxu0 %vm7650_vm1, %v7649_v48  ;;  %v1283_v6 = vsel %vm572_vm2, %v7971_v14, 0.0 }
 0x4b2   : > { %7046 = vmatprep.subr.mxu0 %v7649_v48  ;;  %v1995_v19 = vpop.permute.xlu0 %1994 }
 0x4b6   : > { %v7468_v15 = vpop.eup %7467  ;;  %v2151_v23 = vpop.permute.xlu0 %2150 }
 0x4b7   : > { %v7979_v16 = vmul.f32 %v7468_v15, %v7462_v50  ;;  %v7470_v17 = vpop.eup %7469 }
 0x4b8   : > { %v7986_v18 = vmul.f32 %v7470_v17, %v7460_v47 }
 0x4b9   : > { %7039 = vmatmul.mubr.msk.f32.vlgmr.msra.gmra.mrb[16].mxu0 %vm572_vm2, %v7979_v16 }
 0x4ba   : > { %7047 = vmatpush3.msra.mxu0 %v1686_v7  ;;  %7048 = vmatprep.mubr.msk.f32.mxu0 %vm7650_vm1, %v7649_v48  ;;  %v2307_v25 = vpop.permute.xlu0 %2306 }
 0x4bb   : > { %7056 = vmatprep.subr.mxu0 %v7649_v48 }
 0x4bd   : > { %7049 = vmatmul.mubr.msk.f32.vlgmr.msra.gmra.mrb[18].mxu0 %vm572_vm2, %v7986_v18 }
 0x4be   : > { %7057 = vmatpush3.msra.mxu0 %v1838_v9  ;;  %7058 = vmatprep.mubr.msk.f32.mxu0 %vm7650_vm1, %v7649_v48  ;;  %v2463_v27 = vpop.permute.xlu0 %2462 }
 0x4bf   : > { %7066 = vmatprep.subr.mxu0 %v7649_v48 }
 0x4e0   : > { %v1265_v24 = vpop.xlane.xlu1 %1264 }
 0x4e1   : > { %7471 = vrcp.f32 %v1265_v24 }
 0x4e4   : > { %v2149_v33 = vpop.permute.xlu1 %2148 }
 0x4e8   : > { %v2305_v37 = vpop.permute.xlu1 %2304 }
 0x4eb   : > { %v7472_v26 = vpop.eup %7471 }
 0x4ec   : > { %v7993_v30 = vmul.f32 %v7472_v26, %v7464_v54  ;;  %v2461_v40 = vpop.permute.xlu1 %2460 }
 0x4ee   : > { %7059 = vmatmul.mubr.msk.f32.vlgmr.msra.gmra.mrb[20].mxu0 %vm572_vm2, %v7993_v30 }
 0x4ef   : > { %7067 = vmatpush3.xpose.msk.msra.mxu0 %vm572_vm2, %v1995_v19  ;;  %v1196_v31 = vpop.xlane.xlu0 %1195  ;;  %7068 = vmatprep.mubr.msk.f32.mxu0 %vm7650_vm1, %v7649_v48 }
 0x4f0   : > { %v1218_v32 = vsub.f32 %v1186_v56, %v1196_v31  ;;  %7076 = vmatprep.subr.mxu0 %v7649_v48 }
 0x4f2   : > { %v1226_v34 = vmul.f32 1.442695, %v1218_v32  ;;  %7069 = vmatmul.mubr.msk.f32.vlgmr.msra.gmra.mrb[22].mxu0 %vm572_vm2, %v1993_v22 }
 0x4f3   : > { %7077 = vmatpush3.xpose.msk.msra.mxu0 %vm572_vm2, %v2151_v23  ;;  %v1208_v35 = vpop.xlane.xlu0 %1207  ;;  %7078 = vmatprep.mubr.msk.f32.mxu0 %vm7650_vm1, %v7649_v48 }
 0x4f4   : > { %7473 = vpow2.f32 %v1226_v34  ;;  %v1222_v20 = vsub.f32 %v7951_v57, %v1208_v35  ;;  %7086 = vmatprep.subr.mxu0 %v7649_v48  ;;  %v1287_v34 = vsel %vm572_vm2, %v7979_v16, 0.0  ;;  %v1291_v16 = vsel %vm572_vm2, %v7986_v18, 0.0 }
 0x4f6   : > { %v1234_v36 = vmul.f32 1.442695, %v1222_v20  ;;  %7079 = vmatmul.mubr.msk.f32.vlgmr.msra.gmra.mrb[24].mxu0 %vm572_vm2, %v2149_v33 }
 0x4f7   : > { %7087 = vmatpush3.xpose.msk.msra.mxu0 %vm572_vm2, %v2307_v25  ;;  %7088 = vmatprep.mubr.msk.f32.mxu0 %vm7650_vm1, %v7649_v48  ;;  %v1214_v50 = vpop.xlane.xlu0 %1213 }
 0x4f8   : > { %7475 = vpow2.f32 %v1234_v36  ;;  %7096 = vmatprep.subr.mxu0 %v7649_v48  ;;  %v1224_v51 = vsub.f32 %v7956_v1, %v1214_v50 }
 0x4fa   : > { %7089 = vmatmul.mubr.msk.f32.vlgmr.msra.gmra.mrb[26].mxu0 %vm572_vm2, %v2305_v37  ;;  %v1238_v52 = vmul.f32 1.442695, %v1224_v51 }
 0x4fb   : > { %7097 = vmatpush3.xpose.msk.msra.mxu0 %vm572_vm2, %v2463_v27  ;;  %7098 = vmatprep.mubr.msk.f32.mxu0 %vm7650_vm1, %v7649_v48 }
 0x4fc   : > { %7106 = vmatprep.subr.mxu0 %v7649_v48 }
 0x4fe   : > { %v7474_v41 = vpop.eup %7473  ;;  %7099 = vmatmul.mubr.msk.f32.vlgmr.msra.gmra.mrb[28].mxu0 %vm572_vm2, %v2461_v40 }
 0x4ff   : > { %v1242_v42 = vsel %vm572_vm2, %v7474_v41, 0.0  ;;  %7108 = vmatprep.mubr.msk.f32.mxu0 %vm7650_vm1, %v7649_v48 }
 0x500   : > { %1243 = vadd.xlane.f32.xlu0 %v1242_v42 }
 0x502   : > { %v8021_v43 = vpop.eup %7475 }
 0x503   : > { %v1254_v44 = vsel %vm572_vm2, %v8021_v43, 0.0 }
 0x504   : > { %1255 = vadd.xlane.f32.xlu0 %v1254_v44 }
 0x51a   : > { %1305 = vrot.lane.b32.xlu0 %v7851_v58, %s7652_s19 }
 0x51d   : > { %v1202_v45 = vpop.xlane.xlu1 %1201 }
 0x51e   : > { %v1220_v46 = vsub.f32 %v7967_v4, %v1202_v45  ;;  %1916 = vrot.lane.b32.xlu0 %v7851_v58, %s7654_s21 }
 0x520   : > { %v1230_v28 = vmul.f32 1.442695, %v1220_v46 }
 0x522   : > { %7477 = vpow2.f32 %v1230_v28  ;;  %2072 = vrot.lane.b32.xlu0 %v7856_v60, %s7654_s21 }
 0x523   : > { %7479 = vpow2.f32 %v1238_v52 }
 0x526   : > { %2228 = vrot.lane.b32.xlu0 %v7862_v62, %s7654_s21 }
 0x52a   : > { %2384 = vrot.lane.b32.xlu0 %v7868_v0, %s7654_s21  ;;  %s8729_s21 = scalar_lea.hbm %s8783_s7, %s6782_s13 }
 0x52c   : > { %v7478_v21 = vpop.eup %7477 }
 0x52d   : > { %v1248_v47 = vsel %vm572_vm2, %v7478_v21, 0.0  ;;  %v8046_v29 = vpop.eup %7479 }
 0x52e   : > { %1249 = vadd.xlane.f32.xlu1 %v1248_v47  ;;  %v1260_v53 = vsel %vm572_vm2, %v8046_v29, 0.0 }
 0x53f   : > { %1457 = vrot.lane.b32.xlu1 %v7856_v60, %s7652_s19 }
 0x543   : > { %1609 = vrot.lane.b32.xlu1 %v7862_v62, %s7652_s19 }
 0x547   : > { %1761 = vrot.lane.b32.xlu1 %v7868_v0, %s7652_s19  ;;  %s7660_s19 = smov 72  }
 0x54b   : > { %1914 = vrot.lane.b32.xlu1 %v7851_v58, %s7653_s20 }
 0x56f   : > { %1261 = vadd.xlane.f32.xlu1 %v1260_v53 }
 0x580   : > { %2070 = vrot.lane.b32.xlu1 %v7856_v60, %s7653_s20 }
 0x583   : > { %v8052_v38 = vpop.f32.mrb[14].mxu0 }
 0x584   : > { %v7030_v54 = vpop.f32.mrb[15].mxu0  ;;  %2226 = vrot.lane.b32.xlu1 %v7862_v62, %s7653_s20 }
 0x588   : > { %2382 = vrot.lane.b32.xlu1 %v7868_v0, %s7653_s20 }
 0x58c   : > { %v8058_v55 = vpop.f32.mrb[16].mxu0 }
 0x58d   : > { %v7040_v56 = vpop.f32.mrb[17].mxu0  ;;  %v1244_v57 = vpop.xlane.xlu0 %1243 }
 0x58e   : > { %7481 = vrcp.f32 %v1244_v57 }
 0x590   : > { %v8060_v39 = vpop.f32.mrb[18].mxu0 }
 0x591   : > { %v7050_v1 = vpop.f32.mrb[19].mxu0  ;;  %v1256_v2 = vpop.xlane.xlu0 %1255 }
 0x592   : > { %7483 = vrcp.f32 %v1256_v2  ;;  %v1295_v1 = vsel %vm572_vm2, %v7993_v30, 0.0 }
 0x595   : > { %v1306_v3 = vpop.permute.xlu0 %1305 }
 0x596   : > { %7022 = vmatpush3.msra.mxu1 %v1306_v3 }
 0x597   : > { %7031 = vmatprep.subr.mxu1 %v7649_v48 }
 0x598   : > { %v7482_v4 = vpop.eup %7481 }
 0x599   : > { %v1274_v5 = vmul.f32 %v7482_v4, %v7474_v41  ;;  %v1917_v51 = vpop.permute.xlu0 %1916 }
 0x59b   : > { %v1282_v7 = vsel %vm572_vm2, %v1274_v5, 0.0  ;;  %7024 = vmatmul.mubr.msk.f32.vlgmr.msra.gmra.mrb[10].mxu1 %vm572_vm2, %v1274_v5 }
 0x59c   : > { %v1284_v8 = vadd.f32 %v1283_v6, %v1282_v7  ;;  %7033 = vmatprep.mubr.msk.f32.mxu1 %vm7650_vm1, %v7649_v48  ;;  %v7484_v13 = vpop.eup %7483 }
 0x59d   : > { %v1278_v27 = vmul.f32 %v7484_v13, %v8021_v43  ;;  %v2073_v54 = vpop.permute.xlu0 %2072 }
 0x59f   : > { %v1289_v40 = vsel %vm572_vm2, %v1278_v27, 0.0 }
 0x5bb   : > { %v1250_v9 = vpop.xlane.xlu1 %1249 }
 0x5bc   : > { %7485 = vrcp.f32 %v1250_v9 }
 0x5bf   : > { %v1458_v10 = vpop.permute.xlu1 %1457 }
 0x5c0   : > { %7032 = vmatpush3.msra.mxu1 %v1458_v10 }
 0x5c1   : > { %v8069_v11 = vpop.f32.mrb[20].mxu0  ;;  %7041 = vmatprep.subr.mxu1 %v7649_v48 }
 0x5c2   : > { %v7060_v12 = vpop.f32.mrb[21].mxu0 }
 0x5c3   : > { %v1610_v22 = vpop.permute.xlu1 %1609 }
 0x5c5   : > { %v2066_v14 = vpop.f32.mrb[22].mxu0 }
 0x5c6   : > { %v7486_v15 = vpop.eup %7485  ;;  %v8072_v17 = vmul.f32 0.35355338, %v2066_v14  ;;  %v7070_v19 = vpop.f32.mrb[23].mxu0 }
 0x5c7   : > { %v1276_v23 = vmul.f32 %v7486_v15, %v7478_v21  ;;  %v1762_v36 = vpop.permute.xlu1 %1761 }
 0x5c8   : > { %v2549_v24 = vsel %vm572_vm2, %v8072_v17, -inf }
 0x5c9   : > { %v2222_v25 = vpop.f32.mrb[24].mxu0  ;;  %2550 = vmax.xlane.f32.xlu0 %v2549_v24  ;;  %v1285_v26 = vsel %vm572_vm2, %v1276_v23, 0.0  ;;  %7034 = vmatmul.mubr.msk.f32.vlgmr.msra.gmra.mrb[12].mxu1 %vm572_vm2, %v1276_v23 }
 0x5ca   : > { %v8079_v31 = vmul.f32 0.35355338, %v2222_v25  ;;  %v1286_v32 = vadd.f32 %v1285_v26, %v1284_v8  ;;  %7042 = vmatpush3.msra.mxu1 %v1610_v22  ;;  %v7080_v33 = vpop.f32.mrb[25].mxu0  ;;  %7043 = vmatprep.mubr.msk.f32.mxu1 %vm7650_vm1, %v7649_v48 }
 0x5cb   : > { %7051 = vmatprep.subr.mxu1 %v7649_v48  ;;  %v1915_v18 = vpop.permute.xlu1 %1914 }
 0x5cc   : > { %v2555_v35 = vsel %vm572_vm2, %v8079_v31, -inf  ;;  %v1288_v20 = vadd.f32 %v1287_v34, %v1286_v32 }
 0x5cd   : > { %v2378_v37 = vpop.f32.mrb[26].mxu0  ;;  %2556 = vmax.xlane.f32.xlu1 %v2555_v35  ;;  %7044 = vmatmul.mubr.msk.f32.vlgmr.msra.gmra.mrb[14].mxu1 %vm572_vm2, %v1278_v27 }
 0x5ce   : > { %v8090_v41 = vmul.f32 0.35355338, %v2378_v37  ;;  %v1290_v42 = vadd.f32 %v1289_v40, %v1288_v20  ;;  %7052 = vmatpush3.msra.mxu1 %v1762_v36  ;;  %v7090_v43 = vpop.f32.mrb[27].mxu0  ;;  %7053 = vmatprep.mubr.msk.f32.mxu1 %vm7650_vm1, %v7649_v48 }
 0x5cf   : > { %7061 = vmatprep.subr.mxu1 %v7649_v48 }
 0x5d0   : > { %v2561_v44 = vsel %vm572_vm2, %v8090_v41, -inf  ;;  %v1292_v45 = vadd.f32 %v1291_v16, %v1290_v42 }
 0x5d1   : > { %v2534_v46 = vpop.f32.mrb[28].mxu0  ;;  %2562 = vmax.xlane.f32.xlu0 %v2561_v44 }
 0x5d2   : > { %v8099_v28 = vmul.f32 0.35355338, %v2534_v46  ;;  %v7100_v21 = vpop.f32.mrb[29].mxu0 }
 0x5d4   : > { %v2567_v47 = vsel %vm572_vm2, %v8099_v28, -inf }
 0x5d5   : > { %2568 = vmax.xlane.f32.xlu0 %v2567_v47 }
 0x5de   : > { %2885 = vrot.lane.b32.xlu1 %v7854_v59, %s7655_s22 }
 0x5e2   : > { %3037 = vrot.lane.b32.xlu1 %v7859_v61, %s7655_s22 }
 0x5e6   : > { %3189 = vrot.lane.b32.xlu1 %v7865_v63, %s7655_s22 }
 0x5fc   : > { %v1262_v50 = vpop.xlane.xlu1 %1261 }
 0x5fd   : > { %7487 = vrcp.f32 %v1262_v50 }
 0x600   : > { %v2071_v2 = vpop.permute.xlu1 %2070 }
 0x604   : > { %v2227_v4 = vpop.permute.xlu1 %2226 }
 0x607   : > { %v7488_v52 = vpop.eup %7487 }
 0x608   : > { %v1280_v53 = vmul.f32 %v7488_v52, %v8046_v29  ;;  %v2229_v29 = vpop.permute.xlu0 %2228  ;;  %v2383_v5 = vpop.permute.xlu1 %2382 }
 0x60a   : > { %v1293_v56 = vsel %vm572_vm2, %v1280_v53, 0.0  ;;  %7054 = vmatmul.mubr.msk.f32.vlgmr.msra.gmra.mrb[16].mxu1 %vm572_vm2, %v1280_v53 }
 0x60b   : > { %v1294_v57 = vadd.f32 %v1293_v56, %v1292_v45  ;;  %7062 = vmatpush3.xpose.msk.msra.mxu1 %vm572_vm2, %v1917_v51  ;;  %7063 = vmatprep.mubr.msk.f32.mxu1 %vm7650_vm1, %v7649_v48 }
 0x60c   : > { %7071 = vmatprep.subr.mxu1 %v7649_v48  ;;  %v2385_v30 = vpop.permute.xlu0 %2384 }
 0x60d   : > { %v8118_v3 = vadd.f32 %v1295_v1, %v1294_v57 }
 0x60e   : > { %7064 = vmatmul.mubr.msk.f32.vlgmr.msra.gmra.mrb[18].mxu1 %vm572_vm2, %v1915_v18 }
 0x60f   : > { %7072 = vmatpush3.xpose.msk.msra.mxu1 %vm572_vm2, %v2073_v54  ;;  %7073 = vmatprep.mubr.msk.f32.mxu1 %vm7650_vm1, %v7649_v48 }
 0x610   : > { %7081 = vmatprep.subr.mxu1 %v7649_v48 }
 0x612   : > { %7074 = vmatmul.mubr.msk.f32.vlgmr.msra.gmra.mrb[20].mxu1 %vm572_vm2, %v2071_v2 }
 0x613   : > { %7082 = vmatpush3.xpose.msk.msra.mxu1 %vm572_vm2, %v2229_v29  ;;  %7083 = vmatprep.mubr.msk.f32.mxu1 %vm7650_vm1, %v7649_v48 }
 0x614   : > { %7091 = vmatprep.subr.mxu1 %v7649_v48 }
 0x616   : > { %7084 = vmatmul.mubr.msk.f32.vlgmr.msra.gmra.mrb[22].mxu1 %vm572_vm2, %v2227_v4 }
 0x617   : > { %7092 = vmatpush3.xpose.msk.msra.mxu1 %vm572_vm2, %v2385_v30  ;;  %7093 = vmatprep.mubr.msk.f32.mxu1 %vm7650_vm1, %v7649_v48 }
 0x618   : > { %7101 = vmatprep.subr.mxu1 %v7649_v48 }
 0x61a   : > { %7094 = vmatmul.mubr.msk.f32.vlgmr.msra.gmra.mrb[24].mxu1 %vm572_vm2, %v2383_v5 }
 0x61b   : > { %7103 = vmatprep.mubr.msk.f32.mxu1 %vm7650_vm1, %v7649_v48 }
 0x656   : > { %v2551_v6 = vpop.xlane.xlu0 %2550 }
 0x657   : > { %v2571_v7 = vsub.f32 %v8072_v17, %v2551_v6 }
 0x659   : > { %v2580_v8 = vmul.f32 1.442695, %v2571_v7 }
 0x65a   : > { %v2557_v9 = vpop.xlane.xlu1 %2556 }
 0x65b   : > { %7489 = vpow2.f32 %v2580_v8  ;;  %v2573_v10 = vsub.f32 %v8079_v31, %v2557_v9 }
 0x65d   : > { %v2584_v12 = vmul.f32 1.442695, %v2573_v10 }
 0x65e   : > { %v2563_v23 = vpop.xlane.xlu0 %2562  ;;  %v2886_v46 = vpop.permute.xlu1 %2885 }
 0x65f   : > { %7491 = vpow2.f32 %v2584_v12  ;;  %v2575_v24 = vsub.f32 %v8090_v41, %v2563_v23 }
 0x661   : > { %v2588_v26 = vmul.f32 1.442695, %v2575_v24 }
 0x662   : > { %v2569_v25 = vpop.xlane.xlu0 %2568  ;;  %v3038_v54 = vpop.permute.xlu1 %3037 }
 0x663   : > { %v2577_v27 = vsub.f32 %v8099_v28, %v2569_v25  ;;  %7493 = vpow2.f32 %v2588_v26 }
 0x665   : > { %v8140_v13 = vpop.eup %7489  ;;  %v2592_v31 = vmul.f32 1.442695, %v2577_v27 }
 0x666   : > { %v2597_v14 = vsel %vm572_vm2, %v8140_v13, 0.0  ;;  %v3190_v2 = vpop.permute.xlu1 %3189 }
 0x667   : > { %2598 = vadd.xlane.f32.xlu0 %v2597_v14  ;;  %7495 = vpow2.f32 %v2592_v31 }
 0x669   : > { %v8144_v15 = vpop.eup %7491 }
 0x66a   : > { %v2603_v19 = vsel %vm572_vm2, %v8144_v15, 0.0 }
 0x66b   : > { %2604 = vadd.xlane.f32.xlu1 %v2603_v19 }
 0x66d   : > { %v8156_v32 = vpop.eup %7493 }
 0x66e   : > { %v8148_v17 = vpop.f32.mrb[10].mxu1  ;;  %v2609_v33 = vsel %vm572_vm2, %v8156_v32, 0.0 }
 0x66f   : > { %v7025_v22 = vpop.f32.mrb[11].mxu1 }
 0x671   : > { %v8160_v34 = vpop.eup %7495 }
 0x672   : > { %v2615_v36 = vsel %vm572_vm2, %v8160_v34, 0.0 }
 0x67c   : > { %3525 = vrot.lane.b32.xlu1 %v7851_v58, %s7656_s23 }
 0x67d   : > { %2733 = vrot.lane.b32.xlu0 %v7848_v49, %s7655_s22 }
 0x69c   : > { %v8162_v35 = vpop.f32.mrb[12].mxu1  ;;  %2610 = vadd.xlane.f32.xlu0 %v2609_v33 }
 0x69d   : > { %v7035_v20 = vpop.f32.mrb[13].mxu1 }
 0x6a0   : > { %v8166_v37 = vpop.f32.mrb[14].mxu1  ;;  %2616 = vadd.xlane.f32.xlu1 %v2615_v36 }
 0x6a1   : > { %v7045_v40 = vpop.f32.mrb[15].mxu1 }
 0x6b1   : > { %3603 = vrot.lane.b32.xlu1 %v7848_v49, %s7656_s23 }
 0x6b2   : > { %3527 = vrot.lane.b32.xlu0 %v7851_v58, %s7657_s29 }
 0x6b5   : > { %3681 = vrot.lane.b32.xlu1 %v7856_v60, %s7656_s23 }
 0x6b6   : > { %3605 = vrot.lane.b32.xlu0 %v7848_v49, %s7657_s29 }
 0x6b9   : > { %3759 = vrot.lane.b32.xlu1 %v7854_v59, %s7656_s23 }
 0x6ba   : > { %3683 = vrot.lane.b32.xlu0 %v7856_v60, %s7657_s29 }
 0x6bd   : > { %3837 = vrot.lane.b32.xlu1 %v7862_v62, %s7656_s23 }
 0x6be   : > { %3761 = vrot.lane.b32.xlu0 %v7854_v59, %s7657_s29 }
 0x6c1   : > { %3915 = vrot.lane.b32.xlu1 %v7859_v61, %s7656_s23 }
 0x6c2   : > { %3839 = vrot.lane.b32.xlu0 %v7862_v62, %s7657_s29 }
 0x6c5   : > { %3993 = vrot.lane.b32.xlu1 %v7868_v0, %s7656_s23 }
 0x6c6   : > { %3917 = vrot.lane.b32.xlu0 %v7859_v61, %s7657_s29 }
 0x6c9   : > { %4071 = vrot.lane.b32.xlu1 %v7865_v63, %s7656_s23 }
 0x6ca   : > { %3995 = vrot.lane.b32.xlu0 %v7868_v0, %s7657_s29 }
 0x6ce   : > { %4073 = vrot.lane.b32.xlu0 %v7865_v63, %s7657_s29 }
 0x6dd   : > { %v8190_v41 = vpop.f32.mrb[16].mxu1 }
 0x6de   : > { %v7055_v42 = vpop.f32.mrb[17].mxu1 }
 0x6e1   : > { %v1988_v43 = vpop.f32.mrb[18].mxu1 }
 0x6e2   : > { %v7065_v16 = vpop.f32.mrb[19].mxu1  ;;  %v8192_v28 = vmul.f32 0.35355338, %v1988_v43 }
 0x6e4   : > { %v2546_v51 = vsel %vm572_vm2, %v8192_v28, -inf }
 0x6e5   : > { %v2144_v44 = vpop.f32.mrb[20].mxu1 }
 0x6e6   : > { %v7075_v45 = vpop.f32.mrb[21].mxu1  ;;  %v8194_v21 = vmul.f32 0.35355338, %v2144_v44 }
 0x6e8   : > { %v2552_v52 = vsel %vm572_vm2, %v8194_v21, -inf }
 0x6e9   : > { %v2300_v47 = vpop.f32.mrb[22].mxu1 }
 0x6ea   : > { %v7085_v18 = vpop.f32.mrb[23].mxu1  ;;  %v8196_v50 = vmul.f32 0.35355338, %v2300_v47 }
 0x6ec   : > { %v2558_v1 = vsel %vm572_vm2, %v8196_v50, -inf }
 0x6ed   : > { %v2456_v53 = vpop.f32.mrb[24].mxu1  ;;  %2547 = vmax.xlane.f32.xlu0 %v2546_v51  ;;  %2553 = vmax.xlane.f32.xlu1 %v2552_v52 }
 0x6ee   : > { %v7095_v56 = vpop.f32.mrb[25].mxu1  ;;  %v8202_v57 = vmul.f32 0.35355338, %v2456_v53 }
 0x6f0   : > { %v2564_v4 = vsel %vm572_vm2, %v8202_v57, -inf }
 0x6f1   : > { %2559 = vmax.xlane.f32.xlu0 %v2558_v1 }
 0x6f4   : > { %v2599_v29 = vpop.xlane.xlu0 %2598 }
 0x6f5   : > { %7497 = vrcp.f32 %v2599_v29  ;;  %2565 = vmax.xlane.f32.xlu0 %v2564_v4 }
 0x6f8   : > { %v2605_v30 = vpop.xlane.xlu1 %2604  ;;  %v2734_v5 = vpop.permute.xlu0 %2733 }
 0x6f9   : > { %7499 = vrcp.f32 %v2605_v30  ;;  %7107 = vmatpush3.msra.mxu0 %v2734_v5 }
 0x6fa   : > { %7116 = vmatprep.subr.mxu0 %v7649_v48 }
 0x6fc   : > { %v3526_v10 = vpop.permute.xlu1 %3525 }
 0x6ff   : > { %v7498_v6 = vpop.eup %7497 }
 0x700   : > { %v8210_v7 = vmul.f32 %v7498_v6, %v8140_v13 }
 0x702   : > { %7109 = vmatmul.mubr.msk.f32.vlgmr.msra.gmra.mrb[30].mxu0 %vm572_vm2, %v8210_v7 }
 0x703   : > { %v7500_v8 = vpop.eup %7499  ;;  %7117 = vmatpush3.msra.mxu0 %v2886_v46  ;;  %7118 = vmatprep.mubr.msk.f32.mxu0 %vm7650_vm1, %v7649_v48 }
 0x704   : > { %v8217_v9 = vmul.f32 %v7500_v8, %v8144_v15  ;;  %7126 = vmatprep.subr.mxu0 %v7649_v48 }
 0x706   : > { %7119 = vmatmul.mubr.msk.f32.vlgmr.msra.gmra.mrb[32].mxu0 %vm572_vm2, %v8217_v9 }
 0x707   : > { %7127 = vmatpush3.msra.mxu0 %v3038_v54  ;;  %7128 = vmatprep.mubr.msk.f32.mxu0 %vm7650_vm1, %v7649_v48 }
 0x708   : > { %7136 = vmatprep.subr.mxu0 %v7649_v48 }
 0x729   : > { %v2611_v12 = vpop.xlane.xlu0 %2610 }
 0x72a   : > { %7501 = vrcp.f32 %v2611_v12 }
 0x72d   : > { %v2617_v13 = vpop.xlane.xlu1 %2616  ;;  %v3528_v14 = vpop.permute.xlu0 %3527 }
 0x72e   : > { %7503 = vrcp.f32 %v2617_v13 }
 0x731   : > { %v3606_v22 = vpop.permute.xlu0 %3605  ;;  %v3604_v25 = vpop.permute.xlu1 %3603 }
 0x734   : > { %v7502_v19 = vpop.eup %7501 }
 0x735   : > { %v8226_v15 = vmul.f32 %v7502_v19, %v8156_v32  ;;  %v3684_v26 = vpop.permute.xlu0 %3683  ;;  %v3682_v27 = vpop.permute.xlu1 %3681 }
 0x737   : > { %7129 = vmatmul.mubr.msk.f32.vlgmr.msra.gmra.mrb[34].mxu0 %vm572_vm2, %v8226_v15 }
 0x738   : > { %v7504_v23 = vpop.eup %7503  ;;  %7137 = vmatpush3.msra.mxu0 %v3190_v2  ;;  %7138 = vmatprep.mubr.msk.f32.mxu0 %vm7650_vm1, %v7649_v48 }
 0x739   : > { %v8233_v24 = vmul.f32 %v7504_v23, %v8160_v34  ;;  %7169 = vmatprep.subr.mxu0 %v7649_v48  ;;  %v3762_v31 = vpop.permute.xlu0 %3761  ;;  %v3760_v32 = vpop.permute.xlu1 %3759 }
 0x73b   : > { %7139 = vmatmul.mubr.msk.f32.vlgmr.msra.gmra.mrb[36].mxu0 %vm572_vm2, %v8233_v24 }
 0x73c   : > { %7171 = vmatprep.mubr.msk.f32.mxu0 %vm7650_vm1, %v7649_v48 }
 0x73d   : > { %v3840_v33 = vpop.permute.xlu0 %3839  ;;  %v3838_v34 = vpop.permute.xlu1 %3837 }
 0x73f   : > { %7170 = vmatpush3.xpose.msk.msra.mxu0 %vm572_vm2, %v3528_v14 }
 0x740   : > { %7174 = vmatprep.subr.mxu0 %v7649_v48 }
 0x741   : > { %v3918_v20 = vpop.permute.xlu0 %3917  ;;  %v3916_v36 = vpop.permute.xlu1 %3915 }
 0x742   : > { %7172 = vmatmul.mubr.msk.f32.vlgmr.msra.gmra.mrb[38].mxu0 %vm572_vm2, %v3526_v10 }
 0x743   : > { %7175 = vmatpush3.xpose.msk.msra.mxu0 %vm572_vm2, %v3606_v22  ;;  %7176 = vmatprep.mubr.msk.f32.mxu0 %vm7650_vm1, %v7649_v48 }
 0x744   : > { %7179 = vmatprep.subr.mxu0 %v7649_v48 }
 0x745   : > { %v3996_v40 = vpop.permute.xlu0 %3995  ;;  %v3994_v42 = vpop.permute.xlu1 %3993 }
 0x746   : > { %7177 = vmatmul.mubr.msk.f32.vlgmr.msra.gmra.mrb[40].mxu0 %vm572_vm2, %v3604_v25 }
 0x747   : > { %7180 = vmatpush3.xpose.msk.msra.mxu0 %vm572_vm2, %v3684_v26  ;;  %7181 = vmatprep.mubr.msk.f32.mxu0 %vm7650_vm1, %v7649_v48 }
 0x748   : > { %7184 = vmatprep.subr.mxu0 %v7649_v48 }
 0x749   : > { %v4074_v43 = vpop.permute.xlu0 %4073  ;;  %v4072_v16 = vpop.permute.xlu1 %4071 }
 0x74a   : > { %7182 = vmatmul.mubr.msk.f32.vlgmr.msra.gmra.mrb[42].mxu0 %vm572_vm2, %v3682_v27 }
 0x74b   : > { %7185 = vmatpush3.xpose.msk.msra.mxu0 %vm572_vm2, %v3762_v31  ;;  %7186 = vmatprep.mubr.msk.f32.mxu0 %vm7650_vm1, %v7649_v48 }
 0x74c   : > { %7189 = vmatprep.subr.mxu0 %v7649_v48 }
 0x74e   : > { %7187 = vmatmul.mubr.msk.f32.vlgmr.msra.gmra.mrb[44].mxu0 %vm572_vm2, %v3760_v32 }
 0x74f   : > { %7190 = vmatpush3.xpose.msk.msra.mxu0 %vm572_vm2, %v3840_v33  ;;  %7191 = vmatprep.mubr.msk.f32.mxu0 %vm7650_vm1, %v7649_v48 }
 0x750   : > { %7194 = vmatprep.subr.mxu0 %v7649_v48 }
 0x752   : > { %7192 = vmatmul.mubr.msk.f32.vlgmr.msra.gmra.mrb[46].mxu0 %vm572_vm2, %v3838_v34 }
 0x753   : > { %7195 = vmatpush3.xpose.msk.msra.mxu0 %vm572_vm2, %v3918_v20  ;;  %7196 = vmatprep.mubr.msk.f32.mxu0 %vm7650_vm1, %v7649_v48 }
 0x754   : > { %7199 = vmatprep.subr.mxu0 %v7649_v48 }
 0x756   : > { %7197 = vmatmul.mubr.msk.f32.vlgmr.msra.gmra.mrb[48].mxu0 %vm572_vm2, %v3916_v36 }
 0x757   : > { %7200 = vmatpush3.xpose.msk.msra.mxu0 %vm572_vm2, %v3996_v40  ;;  %7201 = vmatprep.mubr.msk.f32.mxu0 %vm7650_vm1, %v7649_v48 }
 0x758   : > { %7204 = vmatprep.subr.mxu0 %v7649_v48 }
 0x75a   : > { %7202 = vmatmul.mubr.msk.f32.vlgmr.msra.gmra.mrb[50].mxu0 %vm572_vm2, %v3994_v42 }
 0x75b   : > { %7205 = vmatpush3.xpose.msk.msra.mxu0 %vm572_vm2, %v4074_v43  ;;  %7206 = vmatprep.mubr.msk.f32.mxu0 %vm7650_vm1, %v7649_v48 }
 0x75c   : > { %7214 = vmatprep.subr.mxu0 %v7649_v48 }
 0x75e   : > { %7207 = vmatmul.mubr.msk.f32.vlgmr.msra.gmra.mrb[52].mxu0 %vm572_vm2, %v4072_v16 }
 0x75f   : > { %7216 = vmatprep.mubr.msk.f32.mxu0 %vm7650_vm1, %v7649_v48 }
 0x77a   : > { %v2554_v44 = vpop.xlane.xlu1 %2553  ;;  %v2548_v45 = vpop.xlane.xlu0 %2547 }
 0x77b   : > { %v2572_v46 = vsub.f32 %v8194_v21, %v2554_v44  ;;  %v2570_v47 = vsub.f32 %v8192_v28, %v2548_v45 }
 0x77d   : > { %v2582_v18 = vmul.f32 1.442695, %v2572_v46  ;;  %v2578_v51 = vmul.f32 1.442695, %v2570_v47 }
 0x77e   : > { %v2560_v52 = vpop.xlane.xlu0 %2559 }
 0x77f   : > { %7505 = vpow2.f32 %v2582_v18  ;;  %v2574_v53 = vsub.f32 %v8196_v50, %v2560_v52 }
 0x780   : > { %7507 = vpow2.f32 %v2578_v51 }
 0x781   : > { %v2586_v54 = vmul.f32 1.442695, %v2574_v53 }
 0x782   : > { %v2566_v50 = vpop.xlane.xlu0 %2565 }
 0x783   : > { %7509 = vpow2.f32 %v2586_v54  ;;  %v2576_v4 = vsub.f32 %v8202_v57, %v2566_v50 }
 0x785   : > { %v2590_v30 = vmul.f32 1.442695, %v2576_v4 }
 0x787   : > { %7511 = vpow2.f32 %v2590_v30  ;;  %v2635_v30 = vsel %vm572_vm2, %v8210_v7, 0.0 }
 0x789   : > { %v7506_v56 = vpop.eup %7505 }
 0x78a   : > { %v7508_v1 = vpop.eup %7507  ;;  %v2600_v2 = vsel %vm572_vm2, %v7506_v56, 0.0 }
 0x78b   : > { %2601 = vadd.xlane.f32.xlu1 %v2600_v2  ;;  %v2594_v29 = vsel %vm572_vm2, %v7508_v1, 0.0 }
 0x78c   : > { %2595 = vadd.xlane.f32.xlu0 %v2594_v29 }
 0x78d   : > { %v8285_v21 = vpop.eup %7509 }
 0x78e   : > { %v2606_v28 = vsel %vm572_vm2, %v8285_v21, 0.0 }
 0x790   : > { %2607 = vadd.xlane.f32.xlu0 %v2606_v28 }
 0x791   : > { %v8296_v5 = vpop.eup %7511 }
 0x792   : > { %v2612_v6 = vsel %vm572_vm2, %v8296_v5, 0.0 }
 0x79c   : > { %2809 = vrot.lane.b32.xlu1 %v7856_v60, %s7655_s22 }
 0x7a0   : > { %2961 = vrot.lane.b32.xlu1 %v7862_v62, %s7655_s22 }
 0x7a6   : > { %2657 = vrot.lane.b32.xlu0 %v7851_v58, %s7655_s22 }
 0x7c4   : > { %2613 = vadd.xlane.f32.xlu1 %v2612_v6 }
 0x7d5   : > { %v8300_v8 = vpop.f32.mrb[30].mxu0  ;;  %3113 = vrot.lane.b32.xlu1 %v7868_v0, %s7655_s22  ;;  %s7661_s22 = smov 40  }
 0x7d6   : > { %v7110_v10 = vpop.f32.mrb[31].mxu0 }
 0x7d9   : > { %v8304_v12 = vpop.f32.mrb[32].mxu0 }
 0x7da   : > { %v7120_v13 = vpop.f32.mrb[33].mxu0 }
 0x80a   : > { %v8306_v14 = vpop.f32.mrb[34].mxu0 }
 0x80b   : > { %v7130_v57 = vpop.f32.mrb[35].mxu0 }
 0x80e   : > { %v8308_v19 = vpop.f32.mrb[36].mxu0 }
 0x80f   : > { %v7140_v22 = vpop.f32.mrb[37].mxu0 }
 0x815   : > { %v3599_v23 = vpop.f32.mrb[38].mxu0 }
 0x816   : > { %v8310_v25 = vmul.f32 0.35355338, %v3599_v23  ;;  %v7173_v26 = vpop.f32.mrb[39].mxu0 }
 0x818   : > { %v2602_v27 = vpop.xlane.xlu1 %2601  ;;  %v4157_v31 = vsel %vm572_vm2, %v8310_v25, -inf }
 0x819   : > { %7513 = vrcp.f32 %v2602_v27  ;;  %v3677_v32 = vpop.f32.mrb[40].mxu0  ;;  %4158 = vmax.xlane.f32.xlu0 %v4157_v31  ;;  %v2596_v33 = vpop.xlane.xlu0 %2595  ;;  %v2639_v27 = vsel %vm572_vm2, %v8217_v9, 0.0 }
 0x81a   : > { %v8314_v34 = vmul.f32 0.35355338, %v3677_v32  ;;  %7515 = vrcp.f32 %v2596_v33  ;;  %v7178_v20 = vpop.f32.mrb[41].mxu0 }
 0x81c   : > { %v4160_v36 = vsel %vm572_vm2, %v8314_v34, -inf  ;;  %v2810_v29 = vpop.permute.xlu1 %2809 }
 0x81d   : > { %v3755_v40 = vpop.f32.mrb[42].mxu0  ;;  %4161 = vmax.xlane.f32.xlu1 %v4160_v36  ;;  %v2608_v42 = vpop.xlane.xlu0 %2607 }
 0x81e   : > { %v8318_v43 = vmul.f32 0.35355338, %v3755_v40  ;;  %7517 = vrcp.f32 %v2608_v42  ;;  %v7183_v16 = vpop.f32.mrb[43].mxu0  ;;  %v2643_v42 = vsel %vm572_vm2, %v8226_v15, 0.0 }
 0x820   : > { %v4163_v44 = vsel %vm572_vm2, %v8318_v43, -inf  ;;  %v2962_v31 = vpop.permute.xlu1 %2961 }
 0x821   : > { %v3833_v45 = vpop.f32.mrb[44].mxu0  ;;  %4164 = vmax.xlane.f32.xlu0 %v4163_v44  ;;  %v2658_v46 = vpop.permute.xlu0 %2657 }
 0x822   : > { %v8322_v47 = vmul.f32 0.35355338, %v3833_v45  ;;  %7102 = vmatpush3.msra.mxu1 %v2658_v46  ;;  %v7188_v18 = vpop.f32.mrb[45].mxu0 }
 0x823   : > { %v7514_v51 = vpop.eup %7513  ;;  %7111 = vmatprep.subr.mxu1 %v7649_v48 }
 0x824   : > { %v7516_v52 = vpop.eup %7515  ;;  %v4166_v53 = vsel %vm572_vm2, %v8322_v47, -inf  ;;  %v2628_v54 = vmul.f32 %v7514_v51, %v7506_v56 }
 0x825   : > { %v2626_v2 = vmul.f32 %v7516_v52, %v7508_v1  ;;  %v3911_v28 = vpop.f32.mrb[46].mxu0  ;;  %4167 = vmax.xlane.f32.xlu0 %v4166_v53  ;;  %v1297_v53 = vsel %vm572_vm2, %v8118_v3, 0.0 }
 0x826   : > { %v8327_v50 = vmul.f32 0.35355338, %v3911_v28  ;;  %v7193_v4 = vpop.f32.mrb[47].mxu0  ;;  %v2637_v1 = vsel %vm572_vm2, %v2628_v54, 0.0 }
 0x827   : > { %v2634_v6 = vsel %vm572_vm2, %v2626_v2, 0.0  ;;  %7104 = vmatmul.mubr.msk.f32.vlgmr.msra.gmra.mrb[26].mxu1 %vm572_vm2, %v2626_v2 }
 0x828   : > { %v7518_v10 = vpop.eup %7517  ;;  %v2636_v13 = vadd.f32 %v2635_v30, %v2634_v6  ;;  %7112 = vmatpush3.msra.mxu1 %v2810_v29  ;;  %v4169_v56 = vsel %vm572_vm2, %v8327_v50, -inf  ;;  %7113 = vmatprep.mubr.msk.f32.mxu1 %vm7650_vm1, %v7649_v48  ;;  %v2647_v6 = vsel %vm572_vm2, %v8233_v24, 0.0 }
 0x829   : > { %v2630_v57 = vmul.f32 %v7518_v10, %v8285_v21  ;;  %v3989_v22 = vpop.f32.mrb[48].mxu0  ;;  %4170 = vmax.xlane.f32.xlu0 %v4169_v56  ;;  %7121 = vmatprep.subr.mxu1 %v7649_v48 }
 0x82a   : > { %v2638_v7 = vadd.f32 %v2637_v1, %v2636_v13  ;;  %v8340_v23 = vmul.f32 0.35355338, %v3989_v22  ;;  %v7198_v26 = vpop.f32.mrb[49].mxu0 }
 0x82b   : > { %7114 = vmatmul.mubr.msk.f32.vlgmr.msra.gmra.mrb[28].mxu1 %vm572_vm2, %v2628_v54  ;;  %v2641_v21 = vsel %vm572_vm2, %v2630_v57, 0.0  ;;  %v1298_v54 = vrot.slane %v1297_v53, 4 }
 0x82c   : > { %v2640_v32 = vadd.f32 %v2639_v27, %v2638_v7  ;;  %7122 = vmatpush3.msra.mxu1 %v2962_v31  ;;  %v4172_v33 = vsel %vm572_vm2, %v8340_v23, -inf  ;;  %7123 = vmatprep.mubr.msk.f32.mxu1 %vm7650_vm1, %v7649_v48 }
 0x82d   : > { %v4067_v20 = vpop.f32.mrb[50].mxu0  ;;  %4173 = vmax.xlane.f32.xlu1 %v4172_v33  ;;  %7131 = vmatprep.subr.mxu1 %v7649_v48  ;;  %v1299_v4 = vadd.f32 %v1298_v54, %v1297_v53  ;;  %v6698_v33 = vld [vmem:[%s8780_s4 + $0x8] sm:$0xff] }
 0x82e   : > { %v2642_v36 = vadd.f32 %v2641_v21, %v2640_v32  ;;  %v8351_v40 = vmul.f32 0.35355338, %v4067_v20  ;;  %v7203_v9 = vpop.f32.mrb[51].mxu0 }
 0x82f   : > { %7124 = vmatmul.mubr.msk.f32.vlgmr.msra.gmra.mrb[30].mxu1 %vm572_vm2, %v2630_v57  ;;  %v1300_v13 = vrot.slane %v1299_v4, 2 }
 0x830   : > { %v4175_v16 = vsel %vm572_vm2, %v8351_v40, -inf  ;;  %v2644_v44 = vadd.f32 %v2643_v42, %v2642_v36  ;;  %7133 = vmatprep.mubr.msk.f32.mxu1 %vm7650_vm1, %v7649_v48 }
 0x831   : > { %v4145_v45 = vpop.f32.mrb[52].mxu0  ;;  %4176 = vmax.xlane.f32.xlu0 %v4175_v16  ;;  %v1301_v57 = vadd.f32 %v1300_v13, %v1299_v4 }
 0x832   : > { %v8360_v46 = vmul.f32 0.35355338, %v4145_v45  ;;  %v7208_v18 = vpop.f32.mrb[53].mxu0 }
 0x833   : > { %v1302_v7 = vrot.slane %v1301_v57, 1 }
 0x834   : > { %v4178_v51 = vsel %vm572_vm2, %v8360_v46, -inf }
 0x835   : > { %4179 = vmax.xlane.f32.xlu1 %v4178_v51  ;;  %v1303_v27 = vadd.f32 %v1302_v7, %v1301_v57 }
 0x846   : > { %4344 = vrot.lane.b32.xlu1 %v7848_v49, %s7658_s8 }
 0x847   : > { %4268 = vrot.lane.b32.xlu0 %v7851_v58, %s7658_s8 }
 0x84a   : > { %4420 = vrot.lane.b32.xlu1 %v7856_v60, %s7658_s8 }
 0x84b   : > { %4572 = vrot.lane.b32.xlu0 %v7862_v62, %s7658_s8 }
 0x84e   : > { %4496 = vrot.lane.b32.xlu1 %v7854_v59, %s7658_s8 }
 0x851   : > { %v2614_v15 = vpop.xlane.xlu1 %2613 }
 0x852   : > { %4648 = vrot.lane.b32.xlu1 %v7859_v61, %s7658_s8  ;;  %7519 = vrcp.f32 %v2614_v15  ;;  %v8396_v15 = vld [vmem:[%s8780_s4] sm:$0xff] }
 0x855   : > { %v3114_v52 = vpop.permute.xlu1 %3113 }
 0x856   : > { %7132 = vmatpush3.msra.mxu1 %v3114_v52 }
 0x857   : > { %7141 = vmatprep.subr.mxu1 %v6698_v33 }
 0x85c   : > { %v7520_v2 = vpop.eup %7519 }
 0x85d   : > { %v2632_v29 = vmul.f32 %v7520_v2, %v8296_v5 }
 0x85f   : > { %v2645_v28 = vsel %vm572_vm2, %v2632_v29, 0.0  ;;  %7134 = vmatmul.mubr.msk.f32.vlgmr.msra.gmra.mrb[32].mxu1 %vm572_vm2, %v2632_v29 }
 0x860   : > { %v2646_v30 = vadd.f32 %v2645_v28, %v2644_v44  ;;  %7142 = vmatpush3.msra.mxu1 %v6698_v33 }
 0x861   : > { %7155 = vmatprep.subr.mxu1 %v8396_v15 }
 0x862   : > { %v2648_v10 = vadd.f32 %v2647_v6, %v2646_v30 }
 0x864   : > { %v2649_v56 = vsel %vm572_vm2, %v2648_v10, 0.0 }
 0x865   : > { %v2650_v1 = vrot.slane %v2649_v56, 4 }
 0x867   : > { %v2651_v3 = vadd.f32 %v2650_v1, %v2649_v56 }
 0x869   : > { %v2652_v22 = vrot.slane %v2651_v3, 2 }
 0x86b   : > { %v2653_v26 = vadd.f32 %v2652_v22, %v2651_v3 }
 0x86d   : > { %v2654_v5 = vrot.slane %v2653_v26, 1 }
 0x86f   : > { %v2655_v31 = vadd.f32 %v2654_v5, %v2653_v26 }
 0x871   : > { %v8384_v32 = vadd.f32 %v2655_v31, %v1303_v27 }
 0x8a6   : > { %v4159_v24 = vpop.xlane.xlu0 %4158 }
 0x8a7   : > { %v4181_v21 = vsub.f32 %v8310_v25, %v4159_v24 }
 0x8a9   : > { %v4189_v20 = vmul.f32 1.442695, %v4181_v21 }
 0x8aa   : > { %v4162_v36 = vpop.xlane.xlu1 %4161 }
 0x8ab   : > { %7521 = vpow2.f32 %v4189_v20  ;;  %v4182_v9 = vsub.f32 %v8314_v34, %v4162_v36 }
 0x8ad   : > { %v4191_v42 = vmul.f32 1.442695, %v4182_v9 }
 0x8ae   : > { %v4165_v16 = vpop.xlane.xlu0 %4164 }
 0x8af   : > { %7523 = vpow2.f32 %v4191_v42  ;;  %v4183_v44 = vsub.f32 %v8318_v43, %v4165_v16 }
 0x8b1   : > { %v4193_v45 = vmul.f32 1.442695, %v4183_v44 }
 0x8b2   : > { %v4168_v18 = vpop.xlane.xlu0 %4167 }
 0x8b3   : > { %7525 = vpow2.f32 %v4193_v45  ;;  %v4184_v51 = vsub.f32 %v8322_v47, %v4168_v18 }
 0x8b5   : > { %v8398_v25 = vpop.eup %7521  ;;  %v4195_v52 = vmul.f32 1.442695, %v4184_v51 }
 0x8b6   : > { %v4171_v34 = vpop.xlane.xlu0 %4170  ;;  %v4205_v53 = vsel %vm572_vm2, %v8398_v25, 0.0 }
 0x8b7   : > { %7527 = vpow2.f32 %v4195_v52  ;;  %v4185_v43 = vsub.f32 %v8327_v50, %v4171_v34  ;;  %4206 = vadd.xlane.f32.xlu0 %v4205_v53 }
 0x8b9   : > { %v8404_v54 = vpop.eup %7523  ;;  %v4197_v47 = vmul.f32 1.442695, %v4185_v43 }
 0x8ba   : > { %v4174_v2 = vpop.xlane.xlu1 %4173  ;;  %v4208_v29 = vsel %vm572_vm2, %v8404_v54, 0.0 }
 0x8bb   : > { %7529 = vpow2.f32 %v4197_v47  ;;  %v4186_v28 = vsub.f32 %v8340_v23, %v4174_v2  ;;  %4209 = vadd.xlane.f32.xlu1 %v4208_v29 }
 0x8bd   : > { %v8409_v4 = vpop.eup %7525  ;;  %v4199_v30 = vmul.f32 1.442695, %v4186_v28 }
 0x8be   : > { %v4177_v6 = vpop.xlane.xlu0 %4176  ;;  %v4211_v10 = vsel %vm572_vm2, %v8409_v4, 0.0 }
 0x8bf   : > { %7531 = vpow2.f32 %v4199_v30  ;;  %v4187_v50 = vsub.f32 %v8351_v40, %v4177_v6  ;;  %4212 = vadd.xlane.f32.xlu0 %v4211_v10 }
 0x8c1   : > { %v8414_v13 = vpop.eup %7527  ;;  %v4201_v56 = vmul.f32 1.442695, %v4187_v50 }
 0x8c2   : > { %v4180_v1 = vpop.xlane.xlu1 %4179  ;;  %v4214_v57 = vsel %vm572_vm2, %v8414_v13, 0.0 }
 0x8c3   : > { %7533 = vpow2.f32 %v4201_v56  ;;  %v4188_v23 = vsub.f32 %v8360_v46, %v4180_v1  ;;  %4215 = vadd.xlane.f32.xlu1 %v4214_v57 }
 0x8c5   : > { %v8419_v3 = vpop.eup %7529  ;;  %v4203_v22 = vmul.f32 1.442695, %v4188_v23 }
 0x8c6   : > { %v4345_v7 = vpop.permute.xlu1 %4344  ;;  %v4217_v26 = vsel %vm572_vm2, %v8419_v3, 0.0 }
 0x8c7   : > { %7535 = vpow2.f32 %v4203_v22  ;;  %7215 = vmatpush3.msra.mxu0 %v4345_v7  ;;  %4218 = vadd.xlane.f32.xlu0 %v4217_v26 }
 0x8c8   : > { %7224 = vmatprep.subr.mxu0 %v7649_v48 }
 0x8c9   : > { %v8424_v40 = vpop.eup %7531 }
 0x8ca   : > { %v4220_v5 = vsel %vm572_vm2, %v8424_v40, 0.0  ;;  %v4421_v44 = vpop.permute.xlu1 %4420 }
 0x8cb   : > { %4221 = vadd.xlane.f32.xlu1 %v4220_v5 }
 0x8cd   : > { %v8428_v46 = vpop.eup %7533 }
 0x8ce   : > { %v4223_v27 = vsel %vm572_vm2, %v8428_v46, 0.0 }
 0x8cf   : > { %4224 = vadd.xlane.f32.xlu0 %v4223_v27 }
 0x8d1   : > { %v8432_v31 = vpop.eup %7535 }
 0x8d2   : > { %v4226_v33 = vsel %vm572_vm2, %v8432_v31, 0.0 }
 0x8d3   : > { %4227 = vadd.xlane.f32.xlu1 %v4226_v33 }
 0x8e4   : > { %4800 = vrot.lane.b32.xlu1 %v7865_v63, %s7658_s8 }
 0x8e5   : > { %4724 = vrot.lane.b32.xlu0 %v7868_v0, %s7658_s8  ;;  %s278_s8 = sand.u32 1, %s7639_s25  }
 0x8e6   : > { %s8696_s9 = scalar_lea.vmem [#allocation2], %s278_s8  ;;  %s6536_s23 = scalar_lea.sflag [#allocation3], %s278_s8 }
 0x8e8   : > { %5015 = vrot.lane.b32.xlu1 %v7851_v58, %s7659_s18 }
 0x8e9   : > { %5017 = vrot.lane.b32.xlu0 %v7851_v58, %s7660_s19 }
 0x8ec   : > { %5093 = vrot.lane.b32.xlu1 %v7848_v49, %s7659_s18 }
 0x8ed   : > { %5095 = vrot.lane.b32.xlu0 %v7848_v49, %s7660_s19 }
 0x8f0   : > { %5171 = vrot.lane.b32.xlu1 %v7856_v60, %s7659_s18 }
 0x8f1   : > { %5173 = vrot.lane.b32.xlu0 %v7856_v60, %s7660_s19 }
 0x8f4   : > { %5249 = vrot.lane.b32.xlu1 %v7854_v59, %s7659_s18 }
 0x8f5   : > { %5251 = vrot.lane.b32.xlu0 %v7854_v59, %s7660_s19 }
 0x8f8   : > { %5407 = vrot.lane.b32.xlu1 %v7859_v61, %s7660_s19 }
 0x8f9   : > { %5329 = vrot.lane.b32.xlu0 %v7862_v62, %s7660_s19 }
 0x8fa   : > { %v2729_v24 = vpop.f32.mrb[26].mxu1 }
 0x8fb   : > { %v7105_v21 = vpop.f32.mrb[27].mxu1  ;;  %7143 = vmatprep.mubr.msk.f32.mxu1 %vm572_vm2, %v2729_v24 }
 0x8fc   : > { %7144 = vmatmul.mubr.msk.f32.vlgmr.msra.gmra.mrb[34].mxu1 %vm572_vm2, %v8300_v8  ;;  %5405 = vrot.lane.b32.xlu1 %v7859_v61, %s7659_s18 }
 0x8fd   : > { %5327 = vrot.lane.b32.xlu0 %v7862_v62, %s7659_s18  ;;  %7156 = vmatpush3.msra.mxu1 %v8396_v15 }
 0x8fe   : > { %v2881_v20 = vpop.f32.mrb[28].mxu1  ;;  %7209 = vmatprep.subr.mxu1 %v7649_v48 }
 0x8ff   : > { %v7115_v36 = vpop.f32.mrb[29].mxu1  ;;  %7146 = vmatprep.mubr.msk.f32.mxu1 %vm572_vm2, %v2881_v20 }
 0x900   : > { %7147 = vmatmul.mubr.msk.f32.gmra.mrb[36].mxu1 %vm572_vm2, %v8304_v12  ;;  %5563 = vrot.lane.b32.xlu1 %v7865_v63, %s7660_s19  ;;  %v4269_v12 = vpop.permute.xlu0 %4268 }
 0x901   : > { %5485 = vrot.lane.b32.xlu0 %v7868_v0, %s7660_s19  ;;  %s8715_s19 = scalar_lea.vmem %s8782_s6, %s6637_s14 }
 0x902   : > { %v3033_v8 = vpop.f32.mrb[30].mxu1 }
 0x903   : > { %v7125_v9 = vpop.f32.mrb[31].mxu1  ;;  %7149 = vmatprep.mubr.msk.f32.mxu1 %vm572_vm2, %v3033_v8 }
 0x904   : > { %7150 = vmatmul.mubr.msk.f32.gmra.mrb[38].mxu1 %vm572_vm2, %v8306_v14  ;;  %5561 = vrot.lane.b32.xlu1 %v7865_v63, %s7659_s18  ;;  %v4497_v14 = vpop.permute.xlu1 %4496 }
 0x905   : > { %5483 = vrot.lane.b32.xlu0 %v7868_v0, %s7659_s18 }
 0x932   : > { %v3185_v42 = vpop.f32.mrb[32].mxu1 }
 0x933   : > { %v7135_v16 = vpop.f32.mrb[33].mxu1  ;;  %7152 = vmatprep.mubr.msk.f32.mxu1 %vm572_vm2, %v3185_v42 }
 0x934   : > { %7153 = vmatmul.mubr.msk.f32.gmra.mrb[40].mxu1 %vm572_vm2, %v8308_v19  ;;  %v4573_v19 = vpop.permute.xlu0 %4572 }
 0x935   : > { %7157 = vmatprep.mubr.msk.f32.mxu1 %vm572_vm2, %v8148_v17 }
 0x938   : > { %7158 = vmatmul.mubr.msk.f32.vlgmr.msra.gmra.mrb[34].mxu1 %vm572_vm2, %v8052_v38  ;;  %v4649_v38 = vpop.permute.xlu1 %4648 }
 0x939   : > { %7210 = vmatpush3.msra.mxu1 %v4269_v12  ;;  %7160 = vmatprep.mubr.msk.f32.mxu1 %vm572_vm2, %v8162_v35 }
 0x93a   : > { %7219 = vmatprep.subr.mxu1 %v7649_v48 }
 0x93c   : > { %7161 = vmatmul.mubr.msk.f32.gmra.mrb[36].mxu1 %vm572_vm2, %v8058_v55 }
 0x93d   : > { %7163 = vmatprep.mubr.msk.f32.mxu1 %vm572_vm2, %v8166_v37 }
 0x940   : > { %7164 = vmatmul.mubr.msk.f32.gmra.mrb[38].mxu1 %vm572_vm2, %v8060_v39 }
 0x941   : > { %7166 = vmatprep.mubr.msk.f32.mxu1 %vm572_vm2, %v8190_v41 }
 0x944   : > { %v4207_v17 = vpop.xlane.xlu0 %4206  ;;  %7167 = vmatmul.mubr.msk.f32.gmra.mrb[40].mxu1 %vm572_vm2, %v8069_v11 }
 0x945   : > { %7537 = vrcp.f32 %v4207_v17  ;;  %7211 = vmatprep.mubr.msk.f32.mxu1 %vm7650_vm1, %v7649_v48 }
 0x948   : > { %v4210_v55 = vpop.xlane.xlu1 %4209 }
 0x949   : > { %7539 = vrcp.f32 %v4210_v55 }
 0x94c   : > { %v4213_v35 = vpop.xlane.xlu0 %4212 }
 0x94d   : > { %7541 = vrcp.f32 %v4213_v35 }
 0x94f   : > { %v7538_v37 = vpop.eup %7537 }
 0x950   : > { %v4237_v45 = vmul.f32 %v7538_v37, %v8398_v25  ;;  %v4216_v39 = vpop.xlane.xlu1 %4215 }
 0x951   : > { %7543 = vrcp.f32 %v4216_v39 }
 0x952   : > { %7212 = vmatmul.mubr.msk.f32.vlgmr.msra.gmra.mrb[42].mxu1 %vm572_vm2, %v4237_v45  ;;  %v4245_v51 = vsel %vm572_vm2, %v4237_v45, 0.0 }
 0x953   : > { %v7540_v41 = vpop.eup %7539  ;;  %7220 = vmatpush3.msra.mxu1 %v4421_v44  ;;  %7221 = vmatprep.mubr.msk.f32.mxu1 %vm7650_vm1, %v7649_v48 }
 0x954   : > { %v4238_v11 = vmul.f32 %v7540_v41, %v8404_v54  ;;  %v4219_v18 = vpop.xlane.xlu0 %4218  ;;  %7229 = vmatprep.subr.mxu1 %v7649_v48 }
 0x955   : > { %7545 = vrcp.f32 %v4219_v18 }
 0x956   : > { %v4246_v15 = vsel %vm572_vm2, %v4238_v11, 0.0  ;;  %7217 = vmatmul.mubr.msk.f32.vlgmr.msra.gmra.mrb[54].mxu0 %vm572_vm2, %v4238_v11 }
 0x957   : > { %v7542_v25 = vpop.eup %7541  ;;  %v4247_v52 = vadd.f32 %v4246_v15, %v4245_v51  ;;  %7225 = vmatpush3.msra.mxu0 %v4497_v14  ;;  %7226 = vmatprep.mubr.msk.f32.mxu0 %vm7650_vm1, %v7649_v48 }
 0x958   : > { %v4239_v34 = vmul.f32 %v7542_v25, %v8409_v4  ;;  %v4222_v53 = vpop.xlane.xlu1 %4221  ;;  %7234 = vmatprep.subr.mxu0 %v7649_v48 }
 0x959   : > { %7547 = vrcp.f32 %v4222_v53 }
 0x95a   : > { %v4248_v43 = vsel %vm572_vm2, %v4239_v34, 0.0  ;;  %7222 = vmatmul.mubr.msk.f32.vlgmr.msra.gmra.mrb[44].mxu1 %vm572_vm2, %v4239_v34 }
 0x95b   : > { %v7544_v54 = vpop.eup %7543  ;;  %v4249_v47 = vadd.f32 %v4248_v43, %v4247_v52  ;;  %7230 = vmatpush3.msra.mxu1 %v4573_v19  ;;  %7231 = vmatprep.mubr.msk.f32.mxu1 %vm7650_vm1, %v7649_v48 }
 0x95c   : > { %v4240_v2 = vmul.f32 %v7544_v54, %v8414_v13  ;;  %v4225_v29 = vpop.xlane.xlu0 %4224  ;;  %7239 = vmatprep.subr.mxu1 %v7649_v48  ;;  %v6739_v13 = vld [vmem:[%s8780_s4 + $0x10] sm:$0xff] }
 0x95d   : > { %7549 = vrcp.f32 %v4225_v29 }
 0x95e   : > { %v4250_v28 = vsel %vm572_vm2, %v4240_v2, 0.0  ;;  %7227 = vmatmul.mubr.msk.f32.vlgmr.msra.gmra.mrb[56].mxu0 %vm572_vm2, %v4240_v2 }
 0x95f   : > { %v7546_v4 = vpop.eup %7545  ;;  %v4251_v30 = vadd.f32 %v4250_v28, %v4249_v47  ;;  %7235 = vmatpush3.msra.mxu0 %v4649_v38  ;;  %7236 = vmatprep.mubr.msk.f32.mxu0 %vm7650_vm1, %v7649_v48 }
 0x960   : > { %v4241_v6 = vmul.f32 %v7546_v4, %v8419_v3  ;;  %v4228_v10 = vpop.xlane.xlu1 %4227  ;;  %v4725_v50 = vpop.permute.xlu0 %4724  ;;  %7244 = vmatprep.subr.mxu0 %v7649_v48 }
 0x961   : > { %7551 = vrcp.f32 %v4228_v10 }
 0x962   : > { %v4252_v56 = vsel %vm572_vm2, %v4241_v6, 0.0  ;;  %7232 = vmatmul.mubr.msk.f32.vlgmr.msra.gmra.mrb[46].mxu1 %vm572_vm2, %v4241_v6 }
 0x963   : > { %v7548_v1 = vpop.eup %7547  ;;  %v4253_v57 = vadd.f32 %v4252_v56, %v4251_v30  ;;  %7240 = vmatpush3.msra.mxu1 %v4725_v50  ;;  %7241 = vmatprep.mubr.msk.f32.mxu1 %vm7650_vm1, %v7649_v48 }
 0x964   : > { %v4242_v23 = vmul.f32 %v7548_v1, %v8424_v40  ;;  %v4801_v3 = vpop.permute.xlu1 %4800  ;;  %7249 = vmatprep.subr.mxu1 %v6739_v13  ;;  %v5018_v27 = vpop.permute.xlu0 %5017 }
 0x966   : > { %v4254_v22 = vsel %vm572_vm2, %v4242_v23, 0.0  ;;  %7237 = vmatmul.mubr.msk.f32.vlgmr.msra.gmra.mrb[58].mxu0 %vm572_vm2, %v4242_v23 }
 0x967   : > { %v7550_v7 = vpop.eup %7549  ;;  %v4255_v26 = vadd.f32 %v4254_v22, %v4253_v57  ;;  %7245 = vmatpush3.msra.mxu0 %v4801_v3  ;;  %7246 = vmatprep.mubr.msk.f32.mxu0 %vm7650_vm1, %v7649_v48 }
 0x968   : > { %v4243_v5 = vmul.f32 %v7550_v7, %v8428_v46  ;;  %v5016_v33 = vpop.permute.xlu1 %5015  ;;  %7263 = vmatprep.subr.mxu0 %v7649_v48  ;;  %v5096_v9 = vpop.permute.xlu0 %5095 }
 0x96a   : > { %v4256_v40 = vsel %vm572_vm2, %v4243_v5, 0.0  ;;  %7242 = vmatmul.mubr.msk.f32.vlgmr.msra.gmra.mrb[48].mxu1 %vm572_vm2, %v4243_v5 }
 0x96b   : > { %v7552_v24 = vpop.eup %7551  ;;  %v4257_v21 = vadd.f32 %v4256_v40, %v4255_v26  ;;  %7250 = vmatpush3.msra.mxu1 %v6739_v13 }
 0x96c   : > { %v4244_v20 = vmul.f32 %v7552_v24, %v8432_v31  ;;  %v5094_v36 = vpop.permute.xlu1 %5093  ;;  %7283 = vmatprep.subr.mxu1 %v7649_v48  ;;  %v5174_v12 = vpop.permute.xlu0 %5173 }
 0x96e   : > { %v4258_v8 = vsel %vm572_vm2, %v4244_v20, 0.0  ;;  %7247 = vmatmul.mubr.msk.f32.vlgmr.msra.gmra.mrb[60].mxu0 %vm572_vm2, %v4244_v20 }
 0x96f   : > { %v4259_v46 = vadd.f32 %v4258_v8, %v4257_v21  ;;  %7264 = vmatpush3.xpose.msk.msra.mxu0 %vm572_vm2, %v5018_v27  ;;  %7265 = vmatprep.mubr.msk.f32.mxu0 %vm7650_vm1, %v7649_v48 }
 0x970   : > { %v5172_v42 = vpop.permute.xlu1 %5171  ;;  %7268 = vmatprep.subr.mxu0 %v7649_v48  ;;  %v5252_v55 = vpop.permute.xlu0 %5251 }
 0x971   : > { %v4260_v16 = vsel %vm572_vm2, %v4259_v46, 0.0 }
 0x972   : > { %v4261_v31 = vrot.slane %v4260_v16, 4  ;;  %7266 = vmatmul.mubr.msk.f32.vlgmr.msra.gmra.mrb[62].mxu0 %vm572_vm2, %v5016_v33 }
 0x973   : > { %7269 = vmatpush3.xpose.msk.msra.mxu0 %vm572_vm2, %v5096_v9  ;;  %7270 = vmatprep.mubr.msk.f32.mxu0 %vm7650_vm1, %v7649_v48 }
 0x974   : > { %v5250_v44 = vpop.permute.xlu1 %5249  ;;  %7273 = vmatprep.subr.mxu0 %v7649_v48  ;;  %v4262_v14 = vadd.f32 %v4261_v31, %v4260_v16  ;;  %v5330_v15 = vpop.permute.xlu0 %5329 }
 0x976   : > { %7271 = vmatmul.mubr.msk.f32.vlgmr.msra.gmra.mrb[64].mxu0 %vm572_vm2, %v5094_v36  ;;  %v4263_v19 = vrot.slane %v4262_v14, 2 }
 0x977   : > { %7274 = vmatpush3.xpose.msk.msra.mxu0 %vm572_vm2, %v5174_v12  ;;  %7275 = vmatprep.mubr.msk.f32.mxu0 %vm7650_vm1, %v7649_v48 }
 0x978   : > { %v5408_v38 = vpop.permute.xlu1 %5407  ;;  %7278 = vmatprep.subr.mxu0 %v7649_v48  ;;  %v4264_v17 = vadd.f32 %v4263_v19, %v4262_v14  ;;  %v5328_v28 = vpop.permute.xlu0 %5327 }
 0x97a   : > { %7276 = vmatmul.mubr.msk.f32.vlgmr.msra.gmra.mrb[66].mxu0 %vm572_vm2, %v5172_v42  ;;  %v4265_v35 = vrot.slane %v4264_v17, 1 }
 0x97b   : > { %7279 = vmatpush3.xpose.msk.msra.mxu0 %vm572_vm2, %v5252_v55  ;;  %7280 = vmatprep.mubr.msk.f32.mxu0 %vm7650_vm1, %v7649_v48 }
 0x97c   : > { %v5406_v37 = vpop.permute.xlu1 %5405  ;;  %7288 = vmatprep.subr.mxu0 %v7649_v48  ;;  %v4266_v45 = vadd.f32 %v4265_v35, %v4264_v17  ;;  %v5486_v50 = vpop.permute.xlu0 %5485 }
 0x97e   : > { %7281 = vmatmul.mubr.msk.f32.vlgmr.msra.gmra.mrb[68].mxu0 %vm572_vm2, %v5250_v44  ;;  %v8564_v39 = vadd.f32 %v4266_v45, %v8384_v32 }
 0x97f   : > { %7289 = vmatpush3.xpose.msk.msra.mxu0 %vm572_vm2, %v5408_v38  ;;  %7290 = vmatprep.mubr.msk.f32.mxu0 %vm7650_vm1, %v7649_v48 }
 0x980   : > { %v5564_v41 = vpop.permute.xlu1 %5563  ;;  %7298 = vmatprep.subr.mxu0 %v7649_v48  ;;  %v5484_v23 = vpop.permute.xlu0 %5483 }
 0x982   : > { %7291 = vmatmul.mubr.msk.f32.vlgmr.msra.gmra.mrb[70].mxu0 %vm572_vm2, %v5406_v37 }
 0x983   : > { %7299 = vmatpush3.xpose.msk.msra.mxu0 %vm572_vm2, %v5564_v41  ;;  %7300 = vmatprep.mubr.msk.f32.mxu0 %vm7650_vm1, %v7649_v48 }
 0x984   : > { %v5562_v11 = vpop.permute.xlu1 %5561  ;;  %7308 = vmatprep.subr.mxu0 %v7649_v48 }
 0x986   : > { %7301 = vmatmul.mubr.msk.f32.vlgmr.msra.gmra.mrb[72].mxu0 %vm572_vm2, %v5562_v11 }
 0x987   : > { %7310 = vmatprep.mubr.msk.f32.mxu0 %vm7650_vm1, %v7649_v48 }
 0xa25   : > { %v4340_v32 = vpop.f32.mrb[42].mxu1 }
 0xa26   : > { %v7213_v18 = vpop.f32.mrb[43].mxu1  ;;  %7251 = vmatprep.mubr.msk.f32.mxu1 %vm572_vm2, %v4340_v32 }
 0xa29   : > { %v4416_v51 = vpop.f32.mrb[54].mxu0 }
 0xa2a   : > { %v7218_v25 = vpop.f32.mrb[55].mxu0  ;;  %7252 = vmatmul.mubr.msk.f32.vlgmr.msra.gmra.mrb[34].mxu1 %vm572_vm2, %v4416_v51 }
 0xa2b   : > { %7284 = vmatpush3.xpose.msk.msra.mxu1 %vm572_vm2, %v5330_v15 }
 0xa2c   : > { %7293 = vmatprep.subr.mxu1 %v7649_v48 }
 0xa2d   : > { %v4492_v52 = vpop.f32.mrb[44].mxu1 }
 0xa2e   : > { %v7223_v34 = vpop.f32.mrb[45].mxu1  ;;  %7254 = vmatprep.mubr.msk.f32.mxu1 %vm572_vm2, %v4492_v52 }
 0xa31   : > { %v4568_v53 = vpop.f32.mrb[56].mxu0 }
 0xa32   : > { %v7228_v43 = vpop.f32.mrb[57].mxu0  ;;  %7255 = vmatmul.mubr.msk.f32.gmra.mrb[36].mxu1 %vm572_vm2, %v4568_v53 }
 0xa35   : > { %v4644_v54 = vpop.f32.mrb[46].mxu1 }
 0xa36   : > { %v7233_v47 = vpop.f32.mrb[47].mxu1  ;;  %7257 = vmatprep.mubr.msk.f32.mxu1 %vm572_vm2, %v4644_v54 }
 0xa39   : > { %v4720_v2 = vpop.f32.mrb[58].mxu0 }
 0xa3a   : > { %v7238_v29 = vpop.f32.mrb[59].mxu0  ;;  %7258 = vmatmul.mubr.msk.f32.gmra.mrb[38].mxu1 %vm572_vm2, %v4720_v2 }
 0xa3d   : > { %v4796_v4 = vpop.f32.mrb[48].mxu1 }
 0xa3e   : > { %v7243_v30 = vpop.f32.mrb[49].mxu1  ;;  %7260 = vmatprep.mubr.msk.f32.mxu1 %vm572_vm2, %v4796_v4 }
 0xa41   : > { %v4872_v6 = vpop.f32.mrb[60].mxu0 }
 0xa42   : > { %v7248_v10 = vpop.f32.mrb[61].mxu0  ;;  %7261 = vmatmul.mubr.msk.f32.gmra.mrb[40].mxu1 %vm572_vm2, %v4872_v6 }
 0xa43   : > { %7285 = vmatprep.mubr.msk.f32.mxu1 %vm7650_vm1, %v7649_v48 }
 0xa45   : > { %v5089_v13 = vpop.f32.mrb[62].mxu0 }
 0xa46   : > { %v8590_v56 = vmul.f32 0.35355338, %v5089_v13  ;;  %v7267_v1 = vpop.f32.mrb[63].mxu0  ;;  %7286 = vmatmul.mubr.msk.f32.vlgmr.msra.gmra.mrb[50].mxu1 %vm572_vm2, %v5328_v28 }
 0xa47   : > { %7294 = vmatpush3.xpose.msk.msra.mxu1 %vm572_vm2, %v5486_v50  ;;  %7295 = vmatprep.mubr.msk.f32.mxu1 %vm7650_vm1, %v7649_v48 }
 0xa48   : > { %v5647_v57 = vsel %vm572_vm2, %v8590_v56, -inf  ;;  %7303 = vmatprep.subr.mxu1 %v7649_v48 }
 0xa49   : > { %5648 = vmax.xlane.f32.xlu0 %v5647_v57  ;;  %v5167_v3 = vpop.f32.mrb[64].mxu0 }
 0xa4a   : > { %v5640_v22 = vmul.f32 0.35355338, %v5167_v3  ;;  %v7272_v7 = vpop.f32.mrb[65].mxu0  ;;  %7296 = vmatmul.mubr.msk.f32.vlgmr.msra.gmra.mrb[52].mxu1 %vm572_vm2, %v5484_v23 }
 0xa4b   : > { %7305 = vmatprep.mubr.msk.f32.mxu1 %vm7650_vm1, %v7649_v48 }
 0xa4c   : > { %v5650_v26 = vsel %vm572_vm2, %v5640_v22, -inf }
 0xa4d   : > { %5651 = vmax.xlane.f32.xlu1 %v5650_v26  ;;  %v5245_v5 = vpop.f32.mrb[66].mxu0 }
 0xa4e   : > { %v5641_v27 = vmul.f32 0.35355338, %v5245_v5  ;;  %v7277_v33 = vpop.f32.mrb[67].mxu0 }
 0xa50   : > { %v5653_v40 = vsel %vm572_vm2, %v5641_v27, -inf }
 0xa51   : > { %5654 = vmax.xlane.f32.xlu0 %v5653_v40  ;;  %v5323_v24 = vpop.f32.mrb[68].mxu0 }
 0xa52   : > { %v5642_v21 = vmul.f32 0.35355338, %v5323_v24  ;;  %v7282_v20 = vpop.f32.mrb[69].mxu0 }
 0xa54   : > { %v5656_v36 = vsel %vm572_vm2, %v5642_v21, -inf }
 0xa55   : > { %5657 = vmax.xlane.f32.xlu0 %v5656_v36  ;;  %v5479_v8 = vpop.f32.mrb[70].mxu0 }
 0xa56   : > { %v5644_v9 = vmul.f32 0.35355338, %v5479_v8  ;;  %v7292_v46 = vpop.f32.mrb[71].mxu0 }
 0xa58   : > { %v5662_v42 = vsel %vm572_vm2, %v5644_v9, -inf }
 0xa59   : > { %5663 = vmax.xlane.f32.xlu1 %v5662_v42  ;;  %v5635_v16 = vpop.f32.mrb[72].mxu0 }
 0xa5a   : > { %v5646_v31 = vmul.f32 0.35355338, %v5635_v16  ;;  %v7302_v12 = vpop.f32.mrb[73].mxu0 }
 0xa5c   : > { %v5668_v44 = vsel %vm572_vm2, %v5646_v31, -inf }
 0xa5d   : > { %5669 = vmax.xlane.f32.xlu1 %v5668_v44 }
 0xad6   : > { %v5649_v14 = vpop.xlane.xlu0 %5648 }
 0xad7   : > { %v5671_v29 = vsub.f32 %v8590_v56, %v5649_v14 }
 0xad9   : > { %v5679_v28 = vmul.f32 1.442695, %v5671_v29 }
 0xada   : > { %v5652_v19 = vpop.xlane.xlu1 %5651 }
 0xadb   : > { %v5672_v38 = vsub.f32 %v5640_v22, %v5652_v19 }
 0xadd   : > { %v5681_v17 = vmul.f32 1.442695, %v5672_v38 }
 0xade   : > { %v5655_v55 = vpop.xlane.xlu0 %5654 }
 0xadf   : > { %7553 = vpow2.f32 %v5681_v17  ;;  %v5673_v4 = vsub.f32 %v5641_v27, %v5655_v55 }
 0xae1   : > { %v5683_v30 = vmul.f32 1.442695, %v5673_v4 }
 0xae2   : > { %v5658_v35 = vpop.xlane.xlu0 %5657 }
 0xae3   : > { %v5674_v37 = vsub.f32 %v5642_v21, %v5658_v35 }
 0xae5   : > { %v5685_v45 = vmul.f32 1.442695, %v5674_v37 }
 0xae6   : > { %v5664_v41 = vpop.xlane.xlu1 %5663 }
 0xae7   : > { %7555 = vpow2.f32 %v5685_v45  ;;  %v5676_v11 = vsub.f32 %v5644_v9, %v5664_v41 }
 0xae9   : > { %v7554_v32 = vpop.eup %7553  ;;  %v5689_v18 = vmul.f32 1.442695, %v5676_v11 }
 0xaea   : > { %v5670_v51 = vpop.xlane.xlu1 %5669  ;;  %v5698_v15 = vsel %vm572_vm2, %v7554_v32, 0.0 }
 0xaeb   : > { %7557 = vpow2.f32 %v5689_v18  ;;  %v5678_v25 = vsub.f32 %v5646_v31, %v5670_v51  ;;  %5699 = vadd.xlane.f32.xlu1 %v5698_v15 }
 0xaed   : > { %v5693_v52 = vmul.f32 1.442695, %v5678_v25 }
 0xaef   : > { %7559 = vpow2.f32 %v5693_v52 }
 0xaf0   : > { %7561 = vpow2.f32 %v5679_v28  ;;  %v6772_v28 = vld [vmem:[%s8780_s4 + $0x18] sm:$0xff] }
 0xaf1   : > { %v7556_v34 = vpop.eup %7555  ;;  %7563 = vpow2.f32 %v5683_v30 }
 0xaf2   : > { %v5704_v53 = vsel %vm572_vm2, %v7556_v34, 0.0 }
 0xaf3   : > { %5705 = vadd.xlane.f32.xlu1 %v5704_v53 }
 0xaf5   : > { %v7558_v43 = vpop.eup %7557 }
 0xaf6   : > { %v5710_v54 = vsel %vm572_vm2, %v7558_v43, 0.0 }
 0xaf7   : > { %5711 = vadd.xlane.f32.xlu1 %v5710_v54 }
 0xaf9   : > { %v8610_v47 = vpop.eup %7559 }
 0xafa   : > { %v5716_v2 = vsel %vm572_vm2, %v8610_v47, 0.0  ;;  %v8627_v1 = vpop.eup %7561 }
 0xafb   : > { %5717 = vadd.xlane.f32.xlu1 %v5716_v2  ;;  %v8631_v57 = vpop.eup %7563 }
 0xb0c   : > { %5834 = vrot.lane.b32.xlu1 %v7848_v49, %s7661_s22 }
 0xb10   : > { %5910 = vrot.lane.b32.xlu1 %v7856_v60, %s7661_s22 }
 0xb14   : > { %5986 = vrot.lane.b32.xlu1 %v7854_v59, %s7661_s22 }
 0xb18   : > { %6138 = vrot.lane.b32.xlu1 %v7859_v61, %s7661_s22  ;;  %v5695_v61 = vsel %vm572_vm2, %v8627_v1, 0.0 }
 0xb19   : > { %v5401_v6 = vpop.f32.mrb[50].mxu1 }
 0xb1a   : > { %v5643_v10 = vmul.f32 0.35355338, %v5401_v6  ;;  %v7287_v50 = vpop.f32.mrb[51].mxu1 }
 0xb1c   : > { %6290 = vrot.lane.b32.xlu1 %v7865_v63, %s7661_s22  ;;  %v5659_v49 = vsel %vm572_vm2, %v5643_v10, -inf  ;;  %v5701_v63 = vsel %vm572_vm2, %v8631_v57, 0.0 }
 0xb1d   : > { %5660 = vmax.xlane.f32.xlu0 %v5659_v49  ;;  %v5557_v60 = vpop.f32.mrb[52].mxu1 }
 0xb1e   : > { %v5645_v13 = vmul.f32 0.35355338, %v5557_v60  ;;  %v7297_v56 = vpop.f32.mrb[53].mxu1 }
 0xb20   : > { %v5665_v59 = vsel %vm572_vm2, %v5645_v13, -inf }
 0xb21   : > { %5666 = vmax.xlane.f32.xlu0 %v5665_v59 }
 0xb25   : > { %5696 = vadd.xlane.f32.xlu0 %v5695_v61 }
 0xb29   : > { %5702 = vadd.xlane.f32.xlu0 %v5701_v63 }
 0xb3f   : > { %5758 = vrot.lane.b32.xlu0 %v7851_v58, %s7661_s22 }
 0xb43   : > { %6062 = vrot.lane.b32.xlu0 %v7862_v62, %s7661_s22 }
 0xb78   : > { %v5700_v23 = vpop.xlane.xlu1 %5699 }
 0xb79   : > { %7565 = vrcp.f32 %v5700_v23 }
 0xb80   : > { %v5706_v3 = vpop.xlane.xlu1 %5705 }
 0xb81   : > { %7567 = vrcp.f32 %v5706_v3 }
 0xb83   : > { %v7566_v26 = vpop.eup %7565 }
 0xb84   : > { %v5712_v22 = vpop.xlane.xlu1 %5711  ;;  %v5728_v5 = vmul.f32 %v7566_v26, %v7554_v32 }
 0xb85   : > { %7569 = vrcp.f32 %v5712_v22 }
 0xb86   : > { %v5736_v32 = vsel %vm572_vm2, %v5728_v5, 0.0 }
 0xb88   : > { %v5718_v7 = vpop.xlane.xlu1 %5717 }
 0xb89   : > { %7571 = vrcp.f32 %v5718_v7 }
 0xb8b   : > { %v7568_v62 = vpop.eup %7567 }
 0xb8c   : > { %v5835_v27 = vpop.permute.xlu1 %5834  ;;  %v5730_v33 = vmul.f32 %v7568_v62, %v7556_v34 }
 0xb8d   : > { %7309 = vmatpush3.msra.mxu0 %v5835_v27 }
 0xb8e   : > { %7311 = vmatmul.mubr.msk.f32.vlgmr.msra.gmra.mrb[74].mxu0 %vm572_vm2, %v5728_v5  ;;  %7318 = vmatprep.subr.mxu0 %v7649_v48  ;;  %v5740_v53 = vsel %vm572_vm2, %v5730_v33, 0.0 }
 0xb8f   : > { %7320 = vmatprep.mubr.msk.f32.mxu0 %vm7650_vm1, %v7649_v48  ;;  %v7570_v24 = vpop.eup %7569 }
 0xb90   : > { %v5911_v58 = vpop.permute.xlu1 %5910  ;;  %v8647_v21 = vmul.f32 %v7570_v24, %v7558_v43 }
 0xb93   : > { %v7572_v36 = vpop.eup %7571 }
 0xb94   : > { %v5987_v40 = vpop.permute.xlu1 %5986  ;;  %v8655_v8 = vmul.f32 %v7572_v36, %v8610_v47 }
 0xb95   : > { %7319 = vmatpush3.msra.mxu0 %v5987_v40 }
 0xb96   : > { %7321 = vmatmul.mubr.msk.f32.vlgmr.msra.gmra.mrb[76].mxu0 %vm572_vm2, %v5730_v33  ;;  %7328 = vmatprep.subr.mxu0 %v7649_v48  ;;  %v5748_v56 = vsel %vm572_vm2, %v8655_v8, 0.0 }
 0xb97   : > { %7330 = vmatprep.mubr.msk.f32.mxu0 %vm7650_vm1, %v7649_v48 }
 0xb98   : > { %v6139_v20 = vpop.permute.xlu1 %6138 }
 0xb99   : > { %7329 = vmatpush3.msra.mxu0 %v6139_v20 }
 0xb9a   : > { %7331 = vmatmul.mubr.msk.f32.vlgmr.msra.gmra.mrb[78].mxu0 %vm572_vm2, %v8647_v21  ;;  %7338 = vmatprep.subr.mxu0 %v7649_v48 }
 0xb9b   : > { %7340 = vmatprep.mubr.msk.f32.mxu0 %vm7650_vm1, %v7649_v48 }
 0xb9c   : > { %v6291_v9 = vpop.permute.xlu1 %6290 }
 0xb9d   : > { %7339 = vmatpush3.msra.mxu0 %v6291_v9 }
 0xb9e   : > { %7341 = vmatmul.mubr.msk.f32.vlgmr.msra.gmra.mrb[80].mxu0 %vm572_vm2, %v8655_v8 }
 0xbaa   : > { %v5661_v46 = vpop.xlane.xlu0 %5660 }
 0xbab   : > { %v5675_v42 = vsub.f32 %v5643_v10, %v5661_v46 }
 0xbad   : > { %v5687_v16 = vmul.f32 1.442695, %v5675_v42  ;;  %v6781_v42 = vld [vmem:[%s8781_s5] ss:$0 sm:$0xff] }
 0xbae   : > { %v5667_v31 = vpop.xlane.xlu0 %5666 }
 0xbaf   : > { %7573 = vpow2.f32 %v5687_v16  ;;  %v5677_v12 = vsub.f32 %v5645_v13, %v5667_v31 }
 0xbb1   : > { %v5691_v44 = vmul.f32 1.442695, %v5677_v12 }
 0xbb2   : > { %v5697_v14 = vpop.xlane.xlu0 %5696 }
 0xbb3   : > { %7575 = vpow2.f32 %v5691_v44 }
 0xbb4   : > { %7577 = vrcp.f32 %v5697_v14 }
 0xbb6   : > { %v5703_v19 = vpop.xlane.xlu0 %5702 }
 0xbb7   : > { %7579 = vrcp.f32 %v5703_v19 }
 0xbb9   : > { %v7574_v38 = vpop.eup %7573 }
 0xbba   : > { %v5759_v17 = vpop.permute.xlu0 %5758  ;;  %v5707_v55 = vsel %vm572_vm2, %v7574_v38, 0.0 }
 0xbbb   : > { %5708 = vadd.xlane.f32.xlu0 %v5707_v55  ;;  %7304 = vmatpush3.msra.mxu1 %v5759_v17 }
 0xbbc   : > { %7313 = vmatprep.subr.mxu1 %v7649_v48 }
 0xbbd   : > { %v7576_v35 = vpop.eup %7575 }
 0xbbe   : > { %v7578_v37 = vpop.eup %7577  ;;  %v5713_v45 = vsel %vm572_vm2, %v7576_v35, 0.0  ;;  %v6063_v34 = vpop.permute.xlu0 %6062 }
 0xbbf   : > { %v5727_v41 = vmul.f32 %v7578_v37, %v8627_v1  ;;  %5714 = vadd.xlane.f32.xlu0 %v5713_v45 }
 0xbc1   : > { %v7580_v11 = vpop.eup %7579  ;;  %v5735_v18 = vsel %vm572_vm2, %v5727_v41, 0.0  ;;  %7306 = vmatmul.mubr.msk.f32.vlgmr.msra.gmra.mrb[54].mxu1 %vm572_vm2, %v5727_v41 }
 0xbc2   : > { %v5737_v51 = vadd.f32 %v5736_v32, %v5735_v18  ;;  %v5729_v15 = vmul.f32 %v7580_v11, %v8631_v57  ;;  %7314 = vmatpush3.msra.mxu1 %v5911_v58  ;;  %7315 = vmatprep.mubr.msk.f32.mxu1 %vm7650_vm1, %v7649_v48 }
 0xbc3   : > { %7323 = vmatprep.subr.mxu1 %v7649_v48 }
 0xbc4   : > { %v5738_v25 = vsel %vm572_vm2, %v5729_v15, 0.0 }
 0xbc5   : > { %v5739_v52 = vadd.f32 %v5738_v25, %v5737_v51  ;;  %7316 = vmatmul.mubr.msk.f32.vlgmr.msra.gmra.mrb[56].mxu1 %vm572_vm2, %v5729_v15 }
 0xbc6   : > { %7324 = vmatpush3.msra.mxu1 %v6063_v34  ;;  %7325 = vmatprep.mubr.msk.f32.mxu1 %vm7650_vm1, %v7649_v48 }
 0xbc7   : > { %v5741_v43 = vadd.f32 %v5740_v53, %v5739_v52  ;;  %7333 = vmatprep.subr.mxu1 %v7649_v48 }
 0xbd5   : > { %6214 = vrot.lane.b32.xlu0 %v7868_v0, %s7661_s22  ;;  %v5744_v0 = vsel %vm572_vm2, %v8647_v21, 0.0  ;;  %s6552_s22 = sshll.u32 %s8696_s9, 4  ;;  %s6553_s22 = int_to_ptr.vmem [resolvable:$true] %s6552_s22 }
 0xbd6   : > { %s7585_s29 = scalar_lea.vmem %s6553_s22, 16  ;;  %p7592_p0 = scmp.lt.s32.totalorder %s6553_s22, %s7590_s16 }
 0xbd7   : > { %p7586_p11 = scmp.ne.s32.totalorder %s6553_s22, %s7585_s29  ;;  %p7593_p1 = scmp.lt.s32.totalorder %s7591_s17, %s7585_s29 }
 0xbd9   : > { %p7587_p12 = pnand %p7586_p11, %p7741_p5  ;;  %p7594_p2 = por %p7593_p1, %p7592_p0 }
 0xbdb   : > { %p7588_p13 = pneg %p7587_p12 }
 0xbdd   : > { %p7595_p3 = pnand %p7594_p2, %p7588_p13 }
 0xc48   : > { %v5709_v54 = vpop.xlane.xlu0 %5708 }
 0xc49   : > { %7581 = vrcp.f32 %v5709_v54 }
 0xc4c   : > { %v5715_v47 = vpop.xlane.xlu0 %5714 }
 0xc4d   : > { %7583 = vrcp.f32 %v5715_v47 }
 0xc50   : > { %v6215_v30 = vpop.permute.xlu0 %6214 }
 0xc53   : > { %v7582_v2 = vpop.eup %7581 }
 0xc54   : > { %v5731_v29 = vmul.f32 %v7582_v2, %v7574_v38 }
 0xc56   : > { %v5742_v4 = vsel %vm572_vm2, %v5731_v29, 0.0  ;;  %7326 = vmatmul.mubr.msk.f32.vlgmr.msra.gmra.mrb[58].mxu1 %vm572_vm2, %v5731_v29 }
 0xc57   : > { %v7584_v6 = vpop.eup %7583  ;;  %v5743_v10 = vadd.f32 %v5742_v4, %v5741_v43  ;;  %7334 = vmatpush3.msra.mxu1 %v6215_v30  ;;  %7335 = vmatprep.mubr.msk.f32.mxu1 %vm7650_vm1, %v7649_v48 }
 0xc58   : > { %v5733_v50 = vmul.f32 %v7584_v6, %v7576_v35  ;;  %7343 = vmatprep.subr.mxu1 %v6772_v28 }
 0xc59   : > { %v5745_v49 = vadd.f32 %v5744_v0, %v5743_v10 }
 0xc5a   : > { %v5746_v60 = vsel %vm572_vm2, %v5733_v50, 0.0  ;;  %7336 = vmatmul.mubr.msk.f32.vlgmr.msra.gmra.mrb[60].mxu1 %vm572_vm2, %v5733_v50 }
 0xc5b   : > { %v5747_v13 = vadd.f32 %v5746_v60, %v5745_v49  ;;  %7344 = vmatpush3.msra.mxu1 %v6772_v28 }
 0xc5d   : > { %v5749_v59 = vadd.f32 %v5748_v56, %v5747_v13 }
 0xc5f   : > { %v5750_v1 = vsel %vm572_vm2, %v5749_v59, 0.0 }
 0xc60   : > { %v5751_v48 = vrot.slane %v5750_v1, 4 }
 0xc61   : > { %v5906_v61 = vpop.f32.mrb[74].mxu0 }
 0xc62   : > { %v7312_v57 = vpop.f32.mrb[75].mxu0  ;;  %v5752_v63 = vadd.f32 %v5751_v48, %v5750_v1 }
 0xc64   : > { %v5753_v23 = vrot.slane %v5752_v63, 2 }
 0xc66   : > { %v5754_v3 = vadd.f32 %v5753_v23, %v5752_v63 }
 0xc68   : > { %v5755_v22 = vrot.slane %v5754_v3, 1 }
 0xc69   : > { %v6058_v7 = vpop.f32.mrb[76].mxu0 }
 0xc6a   : > { %v7322_v26 = vpop.f32.mrb[77].mxu0  ;;  %v5756_v5 = vadd.f32 %v5755_v22, %v5754_v3 }
 0xc6c   : > { %v5757_v27 = vadd.f32 %v5756_v5, %v8564_v39 }
 0xc6d   : > { %v6210_v58 = vpop.f32.mrb[78].mxu0 }
 0xc6e   : > { %v7332_v62 = vpop.f32.mrb[79].mxu0  ;;  %6529 = vst.msk [vmem:[%s8696_s9] sm:$0x1] %vm6528_vm3, %v5757_v27 }
 0xc71   : > { %v6362_v33 = vpop.f32.mrb[80].mxu0 }
 0xc72   : > { %v7342_v40 = vpop.f32.mrb[81].mxu0 }
 0xc94   : > { %v5830_v24 = vpop.f32.mrb[54].mxu1 }
 0xc95   : > { %v7307_v21 = vpop.f32.mrb[55].mxu1  ;;  %7345 = vmatprep.mubr.msk.f32.mxu1 %vm572_vm2, %v5830_v24 }
 0xc96   : > { %7346 = vmatmul.mubr.msk.f32.vlgmr.msra.gmra.mrb[34].mxu1 %vm572_vm2, %v5906_v61 }
 0xc98   : > { %v5982_v20 = vpop.f32.mrb[56].mxu1 }
 0xc99   : > { %v7317_v36 = vpop.f32.mrb[57].mxu1  ;;  %7348 = vmatprep.mubr.msk.f32.mxu1 %vm572_vm2, %v5982_v20 }
 0xc9a   : > { %7349 = vmatmul.mubr.msk.f32.gmra.mrb[36].mxu1 %vm572_vm2, %v6058_v7 }
 0xd29   : > { %v6134_v39 = vpop.f32.mrb[58].mxu1 }
 0xd2a   : > { %v7327_v8 = vpop.f32.mrb[59].mxu1  ;;  %7351 = vmatprep.mubr.msk.f32.mxu1 %vm572_vm2, %v6134_v39 }
 0xd2b   : > { %7352 = vmatmul.mubr.msk.f32.gmra.mrb[38].mxu1 %vm572_vm2, %v6210_v58 }
 0xd2d   : > { %v6286_v9 = vpop.f32.mrb[60].mxu1 }
 0xd2e   : > { %v7337_v46 = vpop.f32.mrb[61].mxu1  ;;  %7354 = vmatprep.mubr.msk.f32.mxu1 %vm572_vm2, %v6286_v9 }
 0xd2f   : > { %7355 = vmatmul.mubr.msk.f32.gmra.mrb[40].mxu1 %vm572_vm2, %v6362_v33 }
 0xd69   : > { %v7347_v16 = vpop.f32.mrb[34].mxu1 }
 0xd6a   : > { %v6513_v31 = vadd.f32 %v7347_v16, %v6781_v42  ;;  %v6458_v12 = vpop.f32.mrb[35].mxu1 }
 0xd6b   : > { %v6512_v44 = vadd.f32 %v6781_v42, %v6458_v12 }
 0xd6c   : > { %6521 = vst.msk [vmem:[%s8715_s19 + $0x8] sm:$0xff] %vm300_vm0, %v6513_v31 }
 0xd6d   : > { %6520 = vst.msk [vmem:[%s8715_s19] sm:$0xff] %vm300_vm0, %v6512_v44  ;;  %v7350_v14 = vpop.f32.mrb[36].mxu1 }
 0xd6e   : > { %v6515_v19 = vadd.f32 %v7350_v14, %v6781_v42  ;;  %v6468_v38 = vpop.f32.mrb[37].mxu1 }
 0xd6f   : > { %v6514_v17 = vadd.f32 %v6781_v42, %v6468_v38 }
 0xd70   : > { %6523 = vst.msk [vmem:[%s8715_s19 + $0x18] sm:$0xff] %vm300_vm0, %v6515_v19 }
 0xd71   : > { %6522 = vst.msk [vmem:[%s8715_s19 + $0x10] sm:$0xff] %vm300_vm0, %v6514_v17 }
 0xd72   : > { %7598 = shalt.err (!%p7595_p3)
}
 0xd73   : > { %s7599_s28 = scalar_lea.hbm %s8729_s21, 16  ;;  %s7603_s18 = scalar_lea.hbm %s8783_s7, 32 }
 0xd74   : > { %p7600_p4 = scmp.ne.s32.totalorder %s8729_s21, %s7599_s28  ;;  %p7604_p9 = scmp.lt.u32.totalorder %s8729_s21, %s8783_s7 }
 0xd75   : > { %p7605_p10 = scmp.lt.u32.totalorder %s7603_s18, %s7599_s28  ;;  %p7607_p12 = scmp.lt.u32.totalorder %s7599_s28, %s8729_s21 }
 0xd76   : > { %p7601_p7 = pnand %p7600_p4, %p7741_p5 }
 0xd77   : > { %p7606_p11 = por %p7605_p10, %p7604_p9 }
 0xd78   : > { %p7602_p8 = pneg %p7601_p7 }
 0xd79   : > { %p7608_p13 = por %p7607_p12, %p7606_p11 }
 0xd7b   : > { %p7609_p0 = pnand %p7608_p13, %p7602_p8 }
 0xd7d   : > { %7612 = shalt.err (!%p7609_p0)
}
 0xd7e   : > { %7389 = dma.vmem_to_hbm [thread:$0]  (%p7741_p5), %s6553_s22, 16, %s8729_s21, %s6536_s23  }
 0xdfe   : > { %v7353_v55 = vpop.f32.mrb[38].mxu1 }
 0xdff   : > { %v6517_v35 = vadd.f32 %v7353_v55, %v6781_v42  ;;  %v6478_v37 = vpop.f32.mrb[39].mxu1 }
 0xe00   : > { %v6516_v45 = vadd.f32 %v6781_v42, %v6478_v37 }
 0xe01   : > { %6525 = vst.msk [vmem:[%s8715_s19 + $0x28] sm:$0xff] %vm300_vm0, %v6517_v35 }
 0xe02   : > { %6524 = vst.msk [vmem:[%s8715_s19 + $0x20] sm:$0xff] %vm300_vm0, %v6516_v45  ;;  %v7356_v41 = vpop.f32.mrb[40].mxu1 }
 0xe03   : > { %v6519_v11 = vadd.f32 %v7356_v41, %v6781_v42  ;;  %v6488_v32 = vpop.f32.mrb[41].mxu1 }
 0xe04   : > { %v6518_v18 = vadd.f32 %v6781_v42, %v6488_v32 }
 0xe05   : > { %6527 = vst.msk [vmem:[%s8715_s19 + $0x38] sm:$0xff] %vm300_vm0, %v6519_v11 }
 0xe06   : > { %6526 = vst.msk [vmem:[%s8715_s19 + $0x30] sm:$0xff] %vm300_vm0, %v6518_v18 }
 0xe07 PF: > { %p7395_p5 = scmp.ge.s32.totalorder %s7647_s27, 2  ;;  %s6572_s11 = sand.u32 1, %s7635_s24  }
 0xe08   : > { %s6573_s20 = scalar_lea.sflag [#allocation3], %s6572_s11 }
 0xe09   : > { %p7392_p1 = pnand %p7395_p5, %p7745_p6 }
 0xe0b   : > { %7630 = dma.done.wait (!%p7392_p1), %s6573_s20, 16  }
 0xe0c   : > { %7632 = vsyncadd (!%p7392_p1), %s6573_s20, 4294967280  ;;  %p18_p2 = scmp.ge.s32.totalorder %s7728_s30, 4   ;;  %s8786_s24 = smov %s7639_s25 }
 0xe0d   : > { %s8787_s25 = smov %s7643_s26  ;;  %s8788_s26 = smov %s7739_s10 }
 0xe0e   : > { %s8789_s27 = smov %s7728_s30  ;;  %20 = sbr.rel (!%p18_p2) target bundleno = 3 (0x3), region = 94 }
 0xe15   :  { %6577 = vsyncpa [#allocation3], 1 }
 0xe16   :  { %6579 = vsyncpa [#allocation3 + $0x1], 1 }

</bundles_post_ra>
